<compile_context>
chip_gen: v6e
topology: v6e:2x2x1
jax: 0.10.0
libtpu: 0.0.40
codegen_flags: <defaults>
</compile_context>

<pallas_src>
import jax
import jax.numpy as jnp
from jax import lax
from jax.experimental import pallas as pl
from jax.experimental.pallas import tpu as pltpu


# ---------------------------------------------------------------------------
# Pallas kernels
# ---------------------------------------------------------------------------
def _conv_relu_pool_kernel(p_ref, w_ref, b_ref, o_ref):
    """relu(patches @ w + b) followed by MaxPool2d(2).

    patches rows are ordered (pool_corner, n, ph, pw) so the 2x2 max-pool is
    an elementwise max of 4 contiguous row blocks of size m = o_ref.shape[0].
    """
    acc = jnp.dot(p_ref[...], w_ref[...], preferred_element_type=jnp.float32)
    acc = jnp.maximum(acc + b_ref[...], 0.0)
    m = o_ref.shape[0]
    o_ref[...] = jnp.maximum(
        jnp.maximum(acc[0:m], acc[m:2 * m]),
        jnp.maximum(acc[2 * m:3 * m], acc[3 * m:4 * m]),
    )


def _conv_pool_mlp_kernel(p_ref, wc_ref, bc_ref, wf1_ref, bf1_ref,
                          wf2_ref, bf2_ref, wf3_ref, bf3_ref, o_ref, pool_scr):
    """conv2(matmul)+ReLU+MaxPool2d(2) then fc1+ReLU+fc2+ReLU+fc3+ReLU.

    patches rows are ordered (pool_corner, ph, pw, n); after the 4-block max
    the pooled rows are ordered (spatial position p, batch n), so the PyTorch
    `flatten` + fc1 is computed as a sum of per-position matmuls against the
    pre-permuted fc1 weight blocks wf1_ref[p] (no in-kernel reshape needed).
    """
    nb = o_ref.shape[0]            # batch
    n_pos = wf1_ref.shape[0]       # pooled spatial positions (4*4 = 16)

    acc = jnp.dot(p_ref[...], wc_ref[...], preferred_element_type=jnp.float32)
    acc = jnp.maximum(acc + bc_ref[...], 0.0)

    m = n_pos * nb
    pool_scr[...] = jnp.maximum(
        jnp.maximum(acc[0:m], acc[m:2 * m]),
        jnp.maximum(acc[2 * m:3 * m], acc[3 * m:4 * m]),
    )                                                   # (n_pos*nb, oc2)

    # fc1: contraction over (spatial position, channel) as 16 small matmuls.
    h = jnp.dot(pool_scr[0:nb, :], wf1_ref[0], preferred_element_type=jnp.float32)
    for p in range(1, n_pos):
        h = h + jnp.dot(pool_scr[p * nb:(p + 1) * nb, :], wf1_ref[p],
                        preferred_element_type=jnp.float32)
    h = jnp.maximum(h + bf1_ref[...], 0.0)

    h = jnp.maximum(jnp.dot(h, wf2_ref[...], preferred_element_type=jnp.float32)
                    + bf2_ref[...], 0.0)
    o_ref[...] = jnp.maximum(
        jnp.dot(h, wf3_ref[...], preferred_element_type=jnp.float32)
        + bf3_ref[...], 0.0)


# ---------------------------------------------------------------------------
# XLA glue (fused under jit): im2col with pool-friendly row ordering
# ---------------------------------------------------------------------------
def _im2col_pool_rows(a_nhwc, kh, kw, batch_major):
    """a: (N, H, W, C) -> patches (4*N*PH*PW, KH*KW*C).

    Conv output pixel (oh, ow) = (2*ph + py, 2*pw + px).  Rows are ordered
    (py, px, n, ph, pw) if batch_major else (py, px, ph, pw, n); columns are
    ordered (kh, kw, c) (conv weights are permuted to match).
    """
    n, h, w, c = a_nhwc.shape
    oh, ow = h - kh + 1, w - kw + 1
    ph, pw = oh // 2, ow // 2
    k = kh * kw * c
    cols = [a_nhwc[:, i:i + oh, j:j + ow, :] for i in range(kh) for j in range(kw)]
    stk = jnp.stack(cols, axis=3).reshape(n, oh, ow, k)
    r = stk.reshape(n, ph, 2, pw, 2, k)           # (n, ph, py, pw, px, K)
    if batch_major:
        r = r.transpose(2, 4, 0, 1, 3, 5)         # (py, px, n, ph, pw, K)
    else:
        r = r.transpose(2, 4, 1, 3, 0, 5)         # (py, px, ph, pw, n, K)
    return r.reshape(4 * n * ph * pw, k)


def _conv_w_to_mat(w):
    """(OC, IC, KH, KW) -> (KH*KW*IC, OC), matching im2col column order."""
    oc = w.shape[0]
    return w.transpose(2, 3, 1, 0).reshape(-1, oc)


# ---------------------------------------------------------------------------
# LeNet forward (2 pallas_calls total)
# ---------------------------------------------------------------------------
def lenet_forward(x, params):
    n, c_in, h, w = x.shape
    oc1 = params["conv1_w"].shape[0]      # 6
    oc2 = params["conv2_w"].shape[0]      # 16
    f1 = params["fc1_w"].shape[0]         # 120
    f2 = params["fc2_w"].shape[0]         # 84
    num_cls = params["fc3_w"].shape[0]

    x_nhwc = x.transpose(0, 2, 3, 1)

    # ---------------- stage 1: conv1 + relu + pool (1 pallas_call) ----------
    ph1, pw1 = (h - 4) // 2, (w - 4) // 2                 # 12, 12
    p1 = _im2col_pool_rows(x_nhwc, 5, 5, batch_major=True)  # (4*n*144, 25*c_in)
    w1 = _conv_w_to_mat(params["conv1_w"])                  # (25*c_in, 6)
    b1 = params["conv1_b"].reshape(1, oc1)
    rows1, k1 = p1.shape
    m1 = n * ph1 * pw1
    a1 = pl.pallas_call(
        _conv_relu_pool_kernel,
        out_shape=jax.ShapeDtypeStruct((m1, oc1), jnp.float32),
        grid=(1,),
        in_specs=[
            pl.BlockSpec((rows1, k1), lambda i: (0, 0)),
            pl.BlockSpec((k1, oc1), lambda i: (0, 0)),
            pl.BlockSpec((1, oc1), lambda i: (0, 0)),
        ],
        out_specs=pl.BlockSpec((m1, oc1), lambda i: (0, 0)),
    )(p1, w1, b1)
    a1 = a1.reshape(n, ph1, pw1, oc1)                       # NHWC

    # ------- stage 2: conv2 + relu + pool + fc1/fc2/fc3 (1 pallas_call) -----
    ph2, pw2 = (ph1 - 4) // 2, (pw1 - 4) // 2               # 4, 4
    n_pos = ph2 * pw2                                       # 16
    p2 = _im2col_pool_rows(a1, 5, 5, batch_major=False)     # (4*16*n, 150)
    w2 = _conv_w_to_mat(params["conv2_w"])                  # (150, 16)
    b2 = params["conv2_b"].reshape(1, oc2)
    # fc1 weight -> per-spatial-position blocks: wf1[p, c, f] = fc1_w[f, c*n_pos + p]
    wf1 = params["fc1_w"].reshape(f1, oc2, n_pos).transpose(2, 1, 0)
    bf1 = params["fc1_b"].reshape(1, f1)
    wf2 = params["fc2_w"].T                                  # (120, 84)
    bf2 = params["fc2_b"].reshape(1, f2)
    wf3 = params["fc3_w"].T                                  # (84, num_cls)
    bf3 = params["fc3_b"].reshape(1, num_cls)
    rows2, k2 = p2.shape

    out = pl.pallas_call(
        _conv_pool_mlp_kernel,
        out_shape=jax.ShapeDtypeStruct((n, num_cls), jnp.float32),
        grid=(1,),
        in_specs=[
            pl.BlockSpec((rows2, k2), lambda i: (0, 0)),
            pl.BlockSpec((k2, oc2), lambda i: (0, 0)),
            pl.BlockSpec((1, oc2), lambda i: (0, 0)),
            pl.BlockSpec((n_pos, oc2, f1), lambda i: (0, 0, 0)),
            pl.BlockSpec((1, f1), lambda i: (0, 0)),
            pl.BlockSpec((f1, f2), lambda i: (0, 0)),
            pl.BlockSpec((1, f2), lambda i: (0, 0)),
            pl.BlockSpec((f2, num_cls), lambda i: (0, 0)),
            pl.BlockSpec((1, num_cls), lambda i: (0, 0)),
        ],
        out_specs=pl.BlockSpec((n, num_cls), lambda i: (0, 0)),
        scratch_shapes=[pltpu.VMEM((n_pos * n, oc2), jnp.float32)],
    )(p2, w2, b2, wf1, bf1, wf2, bf2, wf3, bf3)
    return out


# ---------------------------------------------------------------------------
# Pure-JAX reference (mirrors the PyTorch module) and parameter init
# ---------------------------------------------------------------------------
def lenet_reference(x, params):
    dn = ("NCHW", "OIHW", "NCHW")
    y = lax.conv_general_dilated(x, params["conv1_w"], (1, 1), "VALID",
                                 dimension_numbers=dn)
    y = jnp.maximum(y + params["conv1_b"].reshape(1, -1, 1, 1), 0.0)
    y = lax.reduce_window(y, -jnp.inf, lax.max, (1, 1, 2, 2), (1, 1, 2, 2), "VALID")
    y = lax.conv_general_dilated(y, params["conv2_w"], (1, 1), "VALID",
                                 dimension_numbers=dn)
    y = jnp.maximum(y + params["conv2_b"].reshape(1, -1, 1, 1), 0.0)
    y = lax.reduce_window(y, -jnp.inf, lax.max, (1, 1, 2, 2), (1, 1, 2, 2), "VALID")
    y = y.reshape(y.shape[0], -1)                          # NCHW flatten
    y = jnp.maximum(y @ params["fc1_w"].T + params["fc1_b"], 0.0)
    y = jnp.maximum(y @ params["fc2_w"].T + params["fc2_b"], 0.0)
    y = jnp.maximum(y @ params["fc3_w"].T + params["fc3_b"], 0.0)
    return y


def init_params(key, num_channels, num_cls, fc_size=256):
    ks = jax.random.split(key, 10)
    s = 0.1
    return {
        "conv1_w": s * jax.random.normal(ks[0], (6, num_channels, 5, 5), jnp.float32),
        "conv1_b": s * jax.random.normal(ks[1], (6,), jnp.float32),
        "conv2_w": s * jax.random.normal(ks[2], (16, 6, 5, 5), jnp.float32),
        "conv2_b": s * jax.random.normal(ks[3], (16,), jnp.float32),
        "fc1_w":   s * jax.random.normal(ks[4], (120, fc_size), jnp.float32),
        "fc1_b":   s * jax.random.normal(ks[5], (120,), jnp.float32),
        "fc2_w":   s * jax.random.normal(ks[6], (84, 120), jnp.float32),
        "fc2_b":   s * jax.random.normal(ks[7], (84,), jnp.float32),
        "fc3_w":   s * jax.random.normal(ks[8], (num_cls, 84), jnp.float32),
        "fc3_b":   s * jax.random.normal(ks[9], (num_cls,), jnp.float32),
    }


if __name__ == "__main__":
    # fc_size=256 (default) implies 16*4*4 after pool2 -> 28x28 input spatial.
    num_channels, num_cls = 3, 10
    batch, h, w = 2, 28, 28

    key = jax.random.PRNGKey(0)
    pkey, xkey = jax.random.split(key)
    params = init_params(pkey, num_channels, num_cls, fc_size=256)
    x = jax.random.normal(xkey, (batch, num_channels, h, w), jnp.float32)

    fwd = jax.jit(lenet_forward)
    out = fwd(x, params)
    jax.block_until_ready(out)

    ref = lenet_reference(x, params)
    assert out.shape == (batch, num_cls), out.shape
    assert bool(jnp.all(out >= 0.0))                       # relu5 at the output
    assert bool(jnp.allclose(out, ref, atol=3e-2, rtol=3e-2)), \
        float(jnp.max(jnp.abs(out - ref)))
    print("KERNEL_OK")
</pallas_src>

<mosaic_0001>
module attributes {stable_mosaic.version = 11 : i64} {
  func.func @_conv_relu_pool_kernel(%arg0: i32, %arg1: memref<1152x75xf32, #tpu.memory_space<vmem>>, %arg2: memref<75x6xf32, #tpu.memory_space<vmem>>, %arg3: memref<1x6xf32, #tpu.memory_space<vmem>>, %arg4: memref<288x6xf32, #tpu.memory_space<vmem>>) attributes {dimension_semantics = [#tpu.dimension_semantics<arbitrary>], iteration_bounds = array<i64: 1>, scalar_prefetch = 0 : i64, scratch_operands = 0 : i64, tpu.core_type = #tpu.core_type<tc>, window_params = [{pipeline_mode = #tpu.pipeline_mode<synchronous>, transform_indices = @transform_0, window_bounds = array<i64: 1152, 75>}, {pipeline_mode = #tpu.pipeline_mode<synchronous>, transform_indices = @transform_1, window_bounds = array<i64: 75, 6>}, {pipeline_mode = #tpu.pipeline_mode<synchronous>, transform_indices = @transform_2, window_bounds = array<i64: 1, 6>}, {pipeline_mode = #tpu.pipeline_mode<synchronous>, transform_indices = @transform_3, window_bounds = array<i64: 288, 6>}]} {
    %c0 = arith.constant 0 : index
    %c0_0 = arith.constant 0 : index
    %0 = vector.load %arg1[%c0, %c0_0] : memref<1152x75xf32, #tpu.memory_space<vmem>>, vector<1152x75xf32>
    %c0_1 = arith.constant 0 : index
    %c0_2 = arith.constant 0 : index
    %1 = vector.load %arg2[%c0_1, %c0_2] : memref<75x6xf32, #tpu.memory_space<vmem>>, vector<75x6xf32>
    %cst = arith.constant dense<0.000000e+00> : vector<1152x6xf32>
    %2 = tpu.matmul %0, %1, %cst {dimension_numbers = #tpu.dot_dimension_numbers<[1], [0], [0], [1], [0, 0, 1, 1], [], []>} : vector<1152x75xf32>, vector<75x6xf32>, vector<1152x6xf32> -> vector<1152x6xf32>
    %c0_3 = arith.constant 0 : index
    %c0_4 = arith.constant 0 : index
    %3 = vector.load %arg3[%c0_3, %c0_4] : memref<1x6xf32, #tpu.memory_space<vmem>>, vector<1x6xf32>
    %4 = vector.broadcast %3 : vector<1x6xf32> to vector<1152x6xf32>
    %5 = arith.addf %2, %4 : vector<1152x6xf32>
    %cst_5 = arith.constant 0.000000e+00 : f32
    %6 = vector.broadcast %cst_5 : f32 to vector<1152x6xf32>
    %7 = arith.maximumf %5, %6 : vector<1152x6xf32>
    %8 = vector.extract_strided_slice %7 {offsets = [0, 0], sizes = [288, 6], strides = [1, 1]} : vector<1152x6xf32> to vector<288x6xf32>
    %9 = vector.extract_strided_slice %7 {offsets = [288, 0], sizes = [288, 6], strides = [1, 1]} : vector<1152x6xf32> to vector<288x6xf32>
    %10 = arith.maximumf %8, %9 : vector<288x6xf32>
    %11 = vector.extract_strided_slice %7 {offsets = [576, 0], sizes = [288, 6], strides = [1, 1]} : vector<1152x6xf32> to vector<288x6xf32>
    %12 = vector.extract_strided_slice %7 {offsets = [864, 0], sizes = [288, 6], strides = [1, 1]} : vector<1152x6xf32> to vector<288x6xf32>
    %13 = arith.maximumf %11, %12 : vector<288x6xf32>
    %14 = arith.maximumf %10, %13 : vector<288x6xf32>
    %c0_6 = arith.constant 0 : index
    %c0_7 = arith.constant 0 : index
    %15 = vector.load %arg4[%c0_6, %c0_7] : memref<288x6xf32, #tpu.memory_space<vmem>>, vector<288x6xf32>
    tpu.vector_store %arg4[%c0_6, %c0_7], %14 {strides = array<i32>} : memref<288x6xf32, #tpu.memory_space<vmem>>, vector<288x6xf32>,
    return
  }
  func.func @transform_0(%arg0: i32) -> (i32, i32) {
    %c0_i32 = arith.constant 0 : i32
    %c0_i32_0 = arith.constant 0 : i32
    %c0_i32_1 = arith.constant 0 : i32
    return %c0_i32, %c0_i32_0 : i32, i32
  }
  func.func @transform_1(%arg0: i32) -> (i32, i32) {
    %c0_i32 = arith.constant 0 : i32
    %c0_i32_0 = arith.constant 0 : i32
    %c0_i32_1 = arith.constant 0 : i32
    return %c0_i32, %c0_i32_0 : i32, i32
  }
  func.func @transform_2(%arg0: i32) -> (i32, i32) {
    %c0_i32 = arith.constant 0 : i32
    %c0_i32_0 = arith.constant 0 : i32
    %c0_i32_1 = arith.constant 0 : i32
    return %c0_i32, %c0_i32_0 : i32, i32
  }
  func.func @transform_3(%arg0: i32) -> (i32, i32) {
    %c0_i32 = arith.constant 0 : i32
    %c0_i32_0 = arith.constant 0 : i32
    %c0_i32_1 = arith.constant 0 : i32
    return %c0_i32, %c0_i32_0 : i32, i32
  }
}

module attributes {stable_mosaic.version = 11 : i64} {
  func.func @_conv_pool_mlp_kernel(%arg0: i32, %arg1: memref<128x150xf32, #tpu.memory_space<vmem>>, %arg2: memref<150x16xf32, #tpu.memory_space<vmem>>, %arg3: memref<1x16xf32, #tpu.memory_space<vmem>>, %arg4: memref<16x16x120xf32, #tpu.memory_space<vmem>>, %arg5: memref<1x120xf32, #tpu.memory_space<vmem>>, %arg6: memref<120x84xf32, #tpu.memory_space<vmem>>, %arg7: memref<1x84xf32, #tpu.memory_space<vmem>>, %arg8: memref<84x10xf32, #tpu.memory_space<vmem>>, %arg9: memref<1x10xf32, #tpu.memory_space<vmem>>, %arg10: memref<2x10xf32, #tpu.memory_space<vmem>>, %arg11: memref<32x16xf32, #tpu.memory_space<vmem>>) attributes {dimension_semantics = [#tpu.dimension_semantics<arbitrary>], iteration_bounds = array<i64: 1>, scalar_prefetch = 0 : i64, scratch_operands = 1 : i64, tpu.core_type = #tpu.core_type<tc>, window_params = [{pipeline_mode = #tpu.pipeline_mode<synchronous>, transform_indices = @transform_0, window_bounds = array<i64: 128, 150>}, {pipeline_mode = #tpu.pipeline_mode<synchronous>, transform_indices = @transform_1, window_bounds = array<i64: 150, 16>}, {pipeline_mode = #tpu.pipeline_mode<synchronous>, transform_indices = @transform_2, window_bounds = array<i64: 1, 16>}, {pipeline_mode = #tpu.pipeline_mode<synchronous>, transform_indices = @transform_3, window_bounds = array<i64: 16, 16, 120>}, {pipeline_mode = #tpu.pipeline_mode<synchronous>, transform_indices = @transform_4, window_bounds = array<i64: 1, 120>}, {pipeline_mode = #tpu.pipeline_mode<synchronous>, transform_indices = @transform_5, window_bounds = array<i64: 120, 84>}, {pipeline_mode = #tpu.pipeline_mode<synchronous>, transform_indices = @transform_6, window_bounds = array<i64: 1, 84>}, {pipeline_mode = #tpu.pipeline_mode<synchronous>, transform_indices = @transform_7, window_bounds = array<i64: 84, 10>}, {pipeline_mode = #tpu.pipeline_mode<synchronous>, transform_indices = @transform_8, window_bounds = array<i64: 1, 10>}, {pipeline_mode = #tpu.pipeline_mode<synchronous>, transform_indices = @transform_9, window_bounds = array<i64: 2, 10>}]} {
    %c0 = arith.constant 0 : index
    %c0_0 = arith.constant 0 : index
    %0 = vector.load %arg1[%c0, %c0_0] : memref<128x150xf32, #tpu.memory_space<vmem>>, vector<128x150xf32>
    %c0_1 = arith.constant 0 : index
    %c0_2 = arith.constant 0 : index
    %1 = vector.load %arg2[%c0_1, %c0_2] : memref<150x16xf32, #tpu.memory_space<vmem>>, vector<150x16xf32>
    %cst = arith.constant dense<0.000000e+00> : vector<128x16xf32>
    %2 = tpu.matmul %0, %1, %cst {dimension_numbers = #tpu.dot_dimension_numbers<[1], [0], [0], [1], [0, 0, 1, 1], [], []>} : vector<128x150xf32>, vector<150x16xf32>, vector<128x16xf32> -> vector<128x16xf32>
    %c0_3 = arith.constant 0 : index
    %c0_4 = arith.constant 0 : index
    %3 = vector.load %arg3[%c0_3, %c0_4] : memref<1x16xf32, #tpu.memory_space<vmem>>, vector<1x16xf32>
    %4 = vector.broadcast %3 : vector<1x16xf32> to vector<128x16xf32>
    %5 = arith.addf %2, %4 : vector<128x16xf32>
    %cst_5 = arith.constant 0.000000e+00 : f32
    %6 = vector.broadcast %cst_5 : f32 to vector<128x16xf32>
    %7 = arith.maximumf %5, %6 : vector<128x16xf32>
    %8 = vector.extract_strided_slice %7 {offsets = [0, 0], sizes = [32, 16], strides = [1, 1]} : vector<128x16xf32> to vector<32x16xf32>
    %9 = vector.extract_strided_slice %7 {offsets = [32, 0], sizes = [32, 16], strides = [1, 1]} : vector<128x16xf32> to vector<32x16xf32>
    %10 = arith.maximumf %8, %9 : vector<32x16xf32>
    %11 = vector.extract_strided_slice %7 {offsets = [64, 0], sizes = [32, 16], strides = [1, 1]} : vector<128x16xf32> to vector<32x16xf32>
    %12 = vector.extract_strided_slice %7 {offsets = [96, 0], sizes = [32, 16], strides = [1, 1]} : vector<128x16xf32> to vector<32x16xf32>
    %13 = arith.maximumf %11, %12 : vector<32x16xf32>
    %14 = arith.maximumf %10, %13 : vector<32x16xf32>
    %c0_6 = arith.constant 0 : index
    %c0_7 = arith.constant 0 : index
    %15 = vector.load %arg11[%c0_6, %c0_7] : memref<32x16xf32, #tpu.memory_space<vmem>>, vector<32x16xf32>
    tpu.vector_store %arg11[%c0_6, %c0_7], %14 {strides = array<i32>} : memref<32x16xf32, #tpu.memory_space<vmem>>, vector<32x16xf32>,
    %c0_8 = arith.constant 0 : index
    %c0_9 = arith.constant 0 : index
    %16 = vector.load %arg11[%c0_8, %c0_9] : memref<32x16xf32, #tpu.memory_space<vmem>>, vector<2x16xf32>
    %c0_10 = arith.constant 0 : index
    %c0_11 = arith.constant 0 : index
    %c0_12 = arith.constant 0 : index
    %17 = vector.load %arg4[%c0_10, %c0_11, %c0_12] : memref<16x16x120xf32, #tpu.memory_space<vmem>>, vector<1x16x120xf32>
    %18 = vector.shape_cast %17 : vector<1x16x120xf32> to vector<16x120xf32>
    %cst_13 = arith.constant dense<0.000000e+00> : vector<2x120xf32>
    %19 = tpu.matmul %16, %18, %cst_13 {dimension_numbers = #tpu.dot_dimension_numbers<[1], [0], [0], [1], [0, 0, 1, 1], [], []>} : vector<2x16xf32>, vector<16x120xf32>, vector<2x120xf32> -> vector<2x120xf32>
    %c2 = arith.constant 2 : index
    %c0_14 = arith.constant 0 : index
    %20 = vector.load %arg11[%c2, %c0_14] : memref<32x16xf32, #tpu.memory_space<vmem>>, vector<2x16xf32>
    %c1 = arith.constant 1 : index
    %c0_15 = arith.constant 0 : index
    %c0_16 = arith.constant 0 : index
    %21 = vector.load %arg4[%c1, %c0_15, %c0_16] : memref<16x16x120xf32, #tpu.memory_space<vmem>>, vector<1x16x120xf32>
    %22 = vector.shape_cast %21 : vector<1x16x120xf32> to vector<16x120xf32>
    %cst_17 = arith.constant dense<0.000000e+00> : vector<2x120xf32>
    %23 = tpu.matmul %20, %22, %cst_17 {dimension_numbers = #tpu.dot_dimension_numbers<[1], [0], [0], [1], [0, 0, 1, 1], [], []>} : vector<2x16xf32>, vector<16x120xf32>, vector<2x120xf32> -> vector<2x120xf32>
    %24 = arith.addf %19, %23 : vector<2x120xf32>
    %c4 = arith.constant 4 : index
    %c0_18 = arith.constant 0 : index
    %25 = vector.load %arg11[%c4, %c0_18] : memref<32x16xf32, #tpu.memory_space<vmem>>, vector<2x16xf32>
    %c2_19 = arith.constant 2 : index
    %c0_20 = arith.constant 0 : index
    %c0_21 = arith.constant 0 : index
    %26 = vector.load %arg4[%c2_19, %c0_20, %c0_21] : memref<16x16x120xf32, #tpu.memory_space<vmem>>, vector<1x16x120xf32>
    %27 = vector.shape_cast %26 : vector<1x16x120xf32> to vector<16x120xf32>
    %cst_22 = arith.constant dense<0.000000e+00> : vector<2x120xf32>
    %28 = tpu.matmul %25, %27, %cst_22 {dimension_numbers = #tpu.dot_dimension_numbers<[1], [0], [0], [1], [0, 0, 1, 1], [], []>} : vector<2x16xf32>, vector<16x120xf32>, vector<2x120xf32> -> vector<2x120xf32>
    %29 = arith.addf %24, %28 : vector<2x120xf32>
    %c6 = arith.constant 6 : index
    %c0_23 = arith.constant 0 : index
    %30 = vector.load %arg11[%c6, %c0_23] : memref<32x16xf32, #tpu.memory_space<vmem>>, vector<2x16xf32>
    %c3 = arith.constant 3 : index
    %c0_24 = arith.constant 0 : index
    %c0_25 = arith.constant 0 : index
    %31 = vector.load %arg4[%c3, %c0_24, %c0_25] : memref<16x16x120xf32, #tpu.memory_space<vmem>>, vector<1x16x120xf32>
    %32 = vector.shape_cast %31 : vector<1x16x120xf32> to vector<16x120xf32>
    %cst_26 = arith.constant dense<0.000000e+00> : vector<2x120xf32>
    %33 = tpu.matmul %30, %32, %cst_26 {dimension_numbers = #tpu.dot_dimension_numbers<[1], [0], [0], [1], [0, 0, 1, 1], [], []>} : vector<2x16xf32>, vector<16x120xf32>, vector<2x120xf32> -> vector<2x120xf32>
    %34 = arith.addf %29, %33 : vector<2x120xf32>
    %c8 = arith.constant 8 : index
    %c0_27 = arith.constant 0 : index
    %35 = vector.load %arg11[%c8, %c0_27] : memref<32x16xf32, #tpu.memory_space<vmem>>, vector<2x16xf32>
    %c4_28 = arith.constant 4 : index
    %c0_29 = arith.constant 0 : index
    %c0_30 = arith.constant 0 : index
    %36 = vector.load %arg4[%c4_28, %c0_29, %c0_30] : memref<16x16x120xf32, #tpu.memory_space<vmem>>, vector<1x16x120xf32>
    %37 = vector.shape_cast %36 : vector<1x16x120xf32> to vector<16x120xf32>
    %cst_31 = arith.constant dense<0.000000e+00> : vector<2x120xf32>
    %38 = tpu.matmul %35, %37, %cst_31 {dimension_numbers = #tpu.dot_dimension_numbers<[1], [0], [0], [1], [0, 0, 1, 1], [], []>} : vector<2x16xf32>, vector<16x120xf32>, vector<2x120xf32> -> vector<2x120xf32>
    %39 = arith.addf %34, %38 : vector<2x120xf32>
    %c10 = arith.constant 10 : index
    %c0_32 = arith.constant 0 : index
    %40 = vector.load %arg11[%c10, %c0_32] : memref<32x16xf32, #tpu.memory_space<vmem>>, vector<2x16xf32>
    %c5 = arith.constant 5 : index
    %c0_33 = arith.constant 0 : index
    %c0_34 = arith.constant 0 : index
    %41 = vector.load %arg4[%c5, %c0_33, %c0_34] : memref<16x16x120xf32, #tpu.memory_space<vmem>>, vector<1x16x120xf32>
    %42 = vector.shape_cast %41 : vector<1x16x120xf32> to vector<16x120xf32>
    %cst_35 = arith.constant dense<0.000000e+00> : vector<2x120xf32>
    %43 = tpu.matmul %40, %42, %cst_35 {dimension_numbers = #tpu.dot_dimension_numbers<[1], [0], [0], [1], [0, 0, 1, 1], [], []>} : vector<2x16xf32>, vector<16x120xf32>, vector<2x120xf32> -> vector<2x120xf32>
    %44 = arith.addf %39, %43 : vector<2x120xf32>
    %c12 = arith.constant 12 : index
    %c0_36 = arith.constant 0 : index
    %45 = vector.load %arg11[%c12, %c0_36] : memref<32x16xf32, #tpu.memory_space<vmem>>, vector<2x16xf32>
    %c6_37 = arith.constant 6 : index
    %c0_38 = arith.constant 0 : index
    %c0_39 = arith.constant 0 : index
    %46 = vector.load %arg4[%c6_37, %c0_38, %c0_39] : memref<16x16x120xf32, #tpu.memory_space<vmem>>, vector<1x16x120xf32>
    %47 = vector.shape_cast %46 : vector<1x16x120xf32> to vector<16x120xf32>
    %cst_40 = arith.constant dense<0.000000e+00> : vector<2x120xf32>
    %48 = tpu.matmul %45, %47, %cst_40 {dimension_numbers = #tpu.dot_dimension_numbers<[1], [0], [0], [1], [0, 0, 1, 1], [], []>} : vector<2x16xf32>, vector<16x120xf32>, vector<2x120xf32> -> vector<2x120xf32>
    %49 = arith.addf %44, %48 : vector<2x120xf32>
    %c14 = arith.constant 14 : index
    %c0_41 = arith.constant 0 : index
    %50 = vector.load %arg11[%c14, %c0_41] : memref<32x16xf32, #tpu.memory_space<vmem>>, vector<2x16xf32>
    %c7 = arith.constant 7 : index
    %c0_42 = arith.constant 0 : index
    %c0_43 = arith.constant 0 : index
    %51 = vector.load %arg4[%c7, %c0_42, %c0_43] : memref<16x16x120xf32, #tpu.memory_space<vmem>>, vector<1x16x120xf32>
    %52 = vector.shape_cast %51 : vector<1x16x120xf32> to vector<16x120xf32>
    %cst_44 = arith.constant dense<0.000000e+00> : vector<2x120xf32>
    %53 = tpu.matmul %50, %52, %cst_44 {dimension_numbers = #tpu.dot_dimension_numbers<[1], [0], [0], [1], [0, 0, 1, 1], [], []>} : vector<2x16xf32>, vector<16x120xf32>, vector<2x120xf32> -> vector<2x120xf32>
    %54 = arith.addf %49, %53 : vector<2x120xf32>
    %c16 = arith.constant 16 : index
    %c0_45 = arith.constant 0 : index
    %55 = vector.load %arg11[%c16, %c0_45] : memref<32x16xf32, #tpu.memory_space<vmem>>, vector<2x16xf32>
    %c8_46 = arith.constant 8 : index
    %c0_47 = arith.constant 0 : index
    %c0_48 = arith.constant 0 : index
    %56 = vector.load %arg4[%c8_46, %c0_47, %c0_48] : memref<16x16x120xf32, #tpu.memory_space<vmem>>, vector<1x16x120xf32>
    %57 = vector.shape_cast %56 : vector<1x16x120xf32> to vector<16x120xf32>
    %cst_49 = arith.constant dense<0.000000e+00> : vector<2x120xf32>
    %58 = tpu.matmul %55, %57, %cst_49 {dimension_numbers = #tpu.dot_dimension_numbers<[1], [0], [0], [1], [0, 0, 1, 1], [], []>} : vector<2x16xf32>, vector<16x120xf32>, vector<2x120xf32> -> vector<2x120xf32>
    %59 = arith.addf %54, %58 : vector<2x120xf32>
    %c18 = arith.constant 18 : index
    %c0_50 = arith.constant 0 : index
    %60 = vector.load %arg11[%c18, %c0_50] : memref<32x16xf32, #tpu.memory_space<vmem>>, vector<2x16xf32>
    %c9 = arith.constant 9 : index
    %c0_51 = arith.constant 0 : index
    %c0_52 = arith.constant 0 : index
    %61 = vector.load %arg4[%c9, %c0_51, %c0_52] : memref<16x16x120xf32, #tpu.memory_space<vmem>>, vector<1x16x120xf32>
    %62 = vector.shape_cast %61 : vector<1x16x120xf32> to vector<16x120xf32>
    %cst_53 = arith.constant dense<0.000000e+00> : vector<2x120xf32>
    %63 = tpu.matmul %60, %62, %cst_53 {dimension_numbers = #tpu.dot_dimension_numbers<[1], [0], [0], [1], [0, 0, 1, 1], [], []>} : vector<2x16xf32>, vector<16x120xf32>, vector<2x120xf32> -> vector<2x120xf32>
    %64 = arith.addf %59, %63 : vector<2x120xf32>
    %c20 = arith.constant 20 : index
    %c0_54 = arith.constant 0 : index
    %65 = vector.load %arg11[%c20, %c0_54] : memref<32x16xf32, #tpu.memory_space<vmem>>, vector<2x16xf32>
    %c10_55 = arith.constant 10 : index
    %c0_56 = arith.constant 0 : index
    %c0_57 = arith.constant 0 : index
    %66 = vector.load %arg4[%c10_55, %c0_56, %c0_57] : memref<16x16x120xf32, #tpu.memory_space<vmem>>, vector<1x16x120xf32>
    %67 = vector.shape_cast %66 : vector<1x16x120xf32> to vector<16x120xf32>
    %cst_58 = arith.constant dense<0.000000e+00> : vector<2x120xf32>
    %68 = tpu.matmul %65, %67, %cst_58 {dimension_numbers = #tpu.dot_dimension_numbers<[1], [0], [0], [1], [0, 0, 1, 1], [], []>} : vector<2x16xf32>, vector<16x120xf32>, vector<2x120xf32> -> vector<2x120xf32>
    %69 = arith.addf %64, %68 : vector<2x120xf32>
    %c22 = arith.constant 22 : index
    %c0_59 = arith.constant 0 : index
    %70 = vector.load %arg11[%c22, %c0_59] : memref<32x16xf32, #tpu.memory_space<vmem>>, vector<2x16xf32>
    %c11 = arith.constant 11 : index
    %c0_60 = arith.constant 0 : index
    %c0_61 = arith.constant 0 : index
    %71 = vector.load %arg4[%c11, %c0_60, %c0_61] : memref<16x16x120xf32, #tpu.memory_space<vmem>>, vector<1x16x120xf32>
    %72 = vector.shape_cast %71 : vector<1x16x120xf32> to vector<16x120xf32>
    %cst_62 = arith.constant dense<0.000000e+00> : vector<2x120xf32>
    %73 = tpu.matmul %70, %72, %cst_62 {dimension_numbers = #tpu.dot_dimension_numbers<[1], [0], [0], [1], [0, 0, 1, 1], [], []>} : vector<2x16xf32>, vector<16x120xf32>, vector<2x120xf32> -> vector<2x120xf32>
    %74 = arith.addf %69, %73 : vector<2x120xf32>
    %c24 = arith.constant 24 : index
    %c0_63 = arith.constant 0 : index
    %75 = vector.load %arg11[%c24, %c0_63] : memref<32x16xf32, #tpu.memory_space<vmem>>, vector<2x16xf32>
    %c12_64 = arith.constant 12 : index
    %c0_65 = arith.constant 0 : index
    %c0_66 = arith.constant 0 : index
    %76 = vector.load %arg4[%c12_64, %c0_65, %c0_66] : memref<16x16x120xf32, #tpu.memory_space<vmem>>, vector<1x16x120xf32>
    %77 = vector.shape_cast %76 : vector<1x16x120xf32> to vector<16x120xf32>
    %cst_67 = arith.constant dense<0.000000e+00> : vector<2x120xf32>
    %78 = tpu.matmul %75, %77, %cst_67 {dimension_numbers = #tpu.dot_dimension_numbers<[1], [0], [0], [1], [0, 0, 1, 1], [], []>} : vector<2x16xf32>, vector<16x120xf32>, vector<2x120xf32> -> vector<2x120xf32>
    %79 = arith.addf %74, %78 : vector<2x120xf32>
    %c26 = arith.constant 26 : index
    %c0_68 = arith.constant 0 : index
    %80 = vector.load %arg11[%c26, %c0_68] : memref<32x16xf32, #tpu.memory_space<vmem>>, vector<2x16xf32>
    %c13 = arith.constant 13 : index
    %c0_69 = arith.constant 0 : index
    %c0_70 = arith.constant 0 : index
    %81 = vector.load %arg4[%c13, %c0_69, %c0_70] : memref<16x16x120xf32, #tpu.memory_space<vmem>>, vector<1x16x120xf32>
    %82 = vector.shape_cast %81 : vector<1x16x120xf32> to vector<16x120xf32>
    %cst_71 = arith.constant dense<0.000000e+00> : vector<2x120xf32>
    %83 = tpu.matmul %80, %82, %cst_71 {dimension_numbers = #tpu.dot_dimension_numbers<[1], [0], [0], [1], [0, 0, 1, 1], [], []>} : vector<2x16xf32>, vector<16x120xf32>, vector<2x120xf32> -> vector<2x120xf32>
    %84 = arith.addf %79, %83 : vector<2x120xf32>
    %c28 = arith.constant 28 : index
    %c0_72 = arith.constant 0 : index
    %85 = vector.load %arg11[%c28, %c0_72] : memref<32x16xf32, #tpu.memory_space<vmem>>, vector<2x16xf32>
    %c14_73 = arith.constant 14 : index
    %c0_74 = arith.constant 0 : index
    %c0_75 = arith.constant 0 : index
    %86 = vector.load %arg4[%c14_73, %c0_74, %c0_75] : memref<16x16x120xf32, #tpu.memory_space<vmem>>, vector<1x16x120xf32>
    %87 = vector.shape_cast %86 : vector<1x16x120xf32> to vector<16x120xf32>
    %cst_76 = arith.constant dense<0.000000e+00> : vector<2x120xf32>
    %88 = tpu.matmul %85, %87, %cst_76 {dimension_numbers = #tpu.dot_dimension_numbers<[1], [0], [0], [1], [0, 0, 1, 1], [], []>} : vector<2x16xf32>, vector<16x120xf32>, vector<2x120xf32> -> vector<2x120xf32>
    %89 = arith.addf %84, %88 : vector<2x120xf32>
    %c30 = arith.constant 30 : index
    %c0_77 = arith.constant 0 : index
    %90 = vector.load %arg11[%c30, %c0_77] : memref<32x16xf32, #tpu.memory_space<vmem>>, vector<2x16xf32>
    %c15 = arith.constant 15 : index
    %c0_78 = arith.constant 0 : index
    %c0_79 = arith.constant 0 : index
    %91 = vector.load %arg4[%c15, %c0_78, %c0_79] : memref<16x16x120xf32, #tpu.memory_space<vmem>>, vector<1x16x120xf32>
    %92 = vector.shape_cast %91 : vector<1x16x120xf32> to vector<16x120xf32>
    %cst_80 = arith.constant dense<0.000000e+00> : vector<2x120xf32>
    %93 = tpu.matmul %90, %92, %cst_80 {dimension_numbers = #tpu.dot_dimension_numbers<[1], [0], [0], [1], [0, 0, 1, 1], [], []>} : vector<2x16xf32>, vector<16x120xf32>, vector<2x120xf32> -> vector<2x120xf32>
    %94 = arith.addf %89, %93 : vector<2x120xf32>
    %c0_81 = arith.constant 0 : index
    %c0_82 = arith.constant 0 : index
    %95 = vector.load %arg5[%c0_81, %c0_82] : memref<1x120xf32, #tpu.memory_space<vmem>>, vector<1x120xf32>
    %96 = vector.broadcast %95 : vector<1x120xf32> to vector<2x120xf32>
    %97 = arith.addf %94, %96 : vector<2x120xf32>
    %cst_83 = arith.constant 0.000000e+00 : f32
    %98 = vector.broadcast %cst_83 : f32 to vector<2x120xf32>
    %99 = arith.maximumf %97, %98 : vector<2x120xf32>
    %c0_84 = arith.constant 0 : index
    %c0_85 = arith.constant 0 : index
    %100 = vector.load %arg6[%c0_84, %c0_85] : memref<120x84xf32, #tpu.memory_space<vmem>>, vector<120x84xf32>
    %cst_86 = arith.constant dense<0.000000e+00> : vector<2x84xf32>
    %101 = tpu.matmul %99, %100, %cst_86 {dimension_numbers = #tpu.dot_dimension_numbers<[1], [0], [0], [1], [0, 0, 1, 1], [], []>} : vector<2x120xf32>, vector<120x84xf32>, vector<2x84xf32> -> vector<2x84xf32>
    %c0_87 = arith.constant 0 : index
    %c0_88 = arith.constant 0 : index
    %102 = vector.load %arg7[%c0_87, %c0_88] : memref<1x84xf32, #tpu.memory_space<vmem>>, vector<1x84xf32>
    %103 = vector.broadcast %102 : vector<1x84xf32> to vector<2x84xf32>
    %104 = arith.addf %101, %103 : vector<2x84xf32>
    %cst_89 = arith.constant 0.000000e+00 : f32
    %105 = vector.broadcast %cst_89 : f32 to vector<2x84xf32>
    %106 = arith.maximumf %104, %105 : vector<2x84xf32>
    %c0_90 = arith.constant 0 : index
    %c0_91 = arith.constant 0 : index
    %107 = vector.load %arg8[%c0_90, %c0_91] : memref<84x10xf32, #tpu.memory_space<vmem>>, vector<84x10xf32>
    %cst_92 = arith.constant dense<0.000000e+00> : vector<2x10xf32>
    %108 = tpu.matmul %106, %107, %cst_92 {dimension_numbers = #tpu.dot_dimension_numbers<[1], [0], [0], [1], [0, 0, 1, 1], [], []>} : vector<2x84xf32>, vector<84x10xf32>, vector<2x10xf32> -> vector<2x10xf32>
    %c0_93 = arith.constant 0 : index
    %c0_94 = arith.constant 0 : index
    %109 = vector.load %arg9[%c0_93, %c0_94] : memref<1x10xf32, #tpu.memory_space<vmem>>, vector<1x10xf32>
    %110 = vector.broadcast %109 : vector<1x10xf32> to vector<2x10xf32>
    %111 = arith.addf %108, %110 : vector<2x10xf32>
    %cst_95 = arith.constant 0.000000e+00 : f32
    %112 = vector.broadcast %cst_95 : f32 to vector<2x10xf32>
    %113 = arith.maximumf %111, %112 : vector<2x10xf32>
    %c0_96 = arith.constant 0 : index
    %c0_97 = arith.constant 0 : index
    %114 = vector.load %arg10[%c0_96, %c0_97] : memref<2x10xf32, #tpu.memory_space<vmem>>, vector<2x10xf32>
    tpu.vector_store %arg10[%c0_96, %c0_97], %113 {strides = array<i32>} : memref<2x10xf32, #tpu.memory_space<vmem>>, vector<2x10xf32>,
    return
  }
  func.func @transform_0(%arg0: i32) -> (i32, i32) {
    %c0_i32 = arith.constant 0 : i32
    %c0_i32_0 = arith.constant 0 : i32
    %c0_i32_1 = arith.constant 0 : i32
    return %c0_i32, %c0_i32_0 : i32, i32
  }
  func.func @transform_1(%arg0: i32) -> (i32, i32) {
    %c0_i32 = arith.constant 0 : i32
    %c0_i32_0 = arith.constant 0 : i32
    %c0_i32_1 = arith.constant 0 : i32
    return %c0_i32, %c0_i32_0 : i32, i32
  }
  func.func @transform_2(%arg0: i32) -> (i32, i32) {
    %c0_i32 = arith.constant 0 : i32
    %c0_i32_0 = arith.constant 0 : i32
    %c0_i32_1 = arith.constant 0 : i32
    return %c0_i32, %c0_i32_0 : i32, i32
  }
  func.func @transform_3(%arg0: i32) -> (i32, i32, i32) {
    %c0_i32 = arith.constant 0 : i32
    %c0_i32_0 = arith.constant 0 : i32
    %c0_i32_1 = arith.constant 0 : i32
    %c0_i32_2 = arith.constant 0 : i32
    return %c0_i32, %c0_i32_0, %c0_i32_1 : i32, i32, i32
  }
  func.func @transform_4(%arg0: i32) -> (i32, i32) {
    %c0_i32 = arith.constant 0 : i32
    %c0_i32_0 = arith.constant 0 : i32
    %c0_i32_1 = arith.constant 0 : i32
    return %c0_i32, %c0_i32_0 : i32, i32
  }
  func.func @transform_5(%arg0: i32) -> (i32, i32) {
    %c0_i32 = arith.constant 0 : i32
    %c0_i32_0 = arith.constant 0 : i32
    %c0_i32_1 = arith.constant 0 : i32
    return %c0_i32, %c0_i32_0 : i32, i32
  }
  func.func @transform_6(%arg0: i32) -> (i32, i32) {
    %c0_i32 = arith.constant 0 : i32
    %c0_i32_0 = arith.constant 0 : i32
    %c0_i32_1 = arith.constant 0 : i32
    return %c0_i32, %c0_i32_0 : i32, i32
  }
  func.func @transform_7(%arg0: i32) -> (i32, i32) {
    %c0_i32 = arith.constant 0 : i32
    %c0_i32_0 = arith.constant 0 : i32
    %c0_i32_1 = arith.constant 0 : i32
    return %c0_i32, %c0_i32_0 : i32, i32
  }
  func.func @transform_8(%arg0: i32) -> (i32, i32) {
    %c0_i32 = arith.constant 0 : i32
    %c0_i32_0 = arith.constant 0 : i32
    %c0_i32_1 = arith.constant 0 : i32
    return %c0_i32, %c0_i32_0 : i32, i32
  }
  func.func @transform_9(%arg0: i32) -> (i32, i32) {
    %c0_i32 = arith.constant 0 : i32
    %c0_i32_0 = arith.constant 0 : i32
    %c0_i32_1 = arith.constant 0 : i32
    return %c0_i32, %c0_i32_0 : i32, i32
  }
}

</mosaic_0001>

<bundles_post_ra>
// kernel: lenet_forward.2
= control target key start
LH: loop header
LB: loop body
LE: loop exit
PB: predicated region body
PF: predicated region fallthrough
CT: control target
= control target key end

     0   :  { %vm608_vm0 = vcmask 1042432   ;;  %vm175_vm1 = vcmask 613376   ;;  %vm1649_vm2 = vcmask 48128   ;;  %s3690_s1 = inlined_call_operand.vmem [shape: f32[75,6], index: 1, kind: input, shape index: {}]   ;;  %s3691_s0 = inlined_call_operand.vmem [shape: f32[1152,75], index: 0, kind: input, shape index: {}]   ;;  %s3692_s2 = inlined_call_operand.vmem [shape: f32[1,6], index: 2, kind: input, shape index: {}]   ;;  %s3693_s3 = inlined_call_operand.vmem [shape: f32[288,6], index: 3, kind: output, shape index: {}]  }
   0x1   :  { %v167_v0 = vld [vmem:[%s3690_s1 + $0x48] sm:$0x7]  ;;  %v166_v1 = vld [vmem:[%s3690_s1 + $0x40] sm:$0xff]  ;;  %v165_v2 = vld [vmem:[%s3690_s1 + $0x38] sm:$0xff] }
   0x2   :  { %1990 = vmatprep.subr.msk.mxu0 %vm608_vm0, %v167_v0  ;;  %2226 = vmatprep.subr.msk.mxu1 %vm608_vm0, %v167_v0  ;;  %v164_v3 = vld [vmem:[%s3690_s1 + $0x30] sm:$0xff]  ;;  %v163_v4 = vld [vmem:[%s3690_s1 + $0x28] sm:$0xff]  ;;  %v162_v5 = vld [vmem:[%s3690_s1 + $0x20] sm:$0xff] }
   0x3   :  { %1991 = vmatpush3.msk.msra.mxu0 %vm608_vm0, %v167_v0  ;;  %2236 = vmatpush3.msk.msra.mxu1 %vm608_vm0, %v167_v0  ;;  %v161_v6 = vld [vmem:[%s3690_s1 + $0x18] sm:$0xff]  ;;  %v160_v7 = vld [vmem:[%s3690_s1 + $0x10] sm:$0xff]  ;;  %v159_v8 = vld [vmem:[%s3690_s1 + $0x8] sm:$0xff] }
   0x4   :  { %1992 = vmatprep.subr.mxu0 %v166_v1  ;;  %2227 = vmatprep.subr.mxu1 %v166_v1  ;;  %v158_v9 = vld [vmem:[%s3690_s1] sm:$0xff]  ;;  %v15_v12 = vld [vmem:[%s3691_s0 + $0x8] sm:$0xff]  ;;  %v16_v14 = vld [vmem:[%s3691_s0 + $0x10] sm:$0xff] }
   0x5   :  { %1993 = vmatpush3.msra.mxu0 %v166_v1  ;;  %2237 = vmatpush3.msra.mxu1 %v166_v1  ;;  %v14_v10 = vld [vmem:[%s3691_s0] sm:$0xff]  ;;  %v87_v13 = vld [vmem:[%s3691_s0 + $0x248] sm:$0xff]  ;;  %v88_v15 = vld [vmem:[%s3691_s0 + $0x250] sm:$0xff] }
   0x6   :  { %1994 = vmatprep.subr.mxu0 %v165_v2  ;;  %2228 = vmatprep.subr.mxu1 %v165_v2  ;;  %v86_v11 = vld [vmem:[%s3691_s0 + $0x240] sm:$0xff]  ;;  %v17_v16 = vld [vmem:[%s3691_s0 + $0x18] sm:$0xff]  ;;  %v19_v20 = vld [vmem:[%s3691_s0 + $0x28] sm:$0xff] }
   0x7   :  { %1995 = vmatpush3.msra.mxu0 %v165_v2  ;;  %2238 = vmatpush3.msra.mxu1 %v165_v2  ;;  %v89_v17 = vld [vmem:[%s3691_s0 + $0x258] sm:$0xff]  ;;  %v18_v18 = vld [vmem:[%s3691_s0 + $0x20] sm:$0xff]  ;;  %v91_v21 = vld [vmem:[%s3691_s0 + $0x268] sm:$0xff] }
   0x8   :  { %1996 = vmatprep.subr.mxu0 %v164_v3  ;;  %2229 = vmatprep.subr.mxu1 %v164_v3  ;;  %v90_v19 = vld [vmem:[%s3691_s0 + $0x260] sm:$0xff]  ;;  %v20_v22 = vld [vmem:[%s3691_s0 + $0x30] sm:$0xff]  ;;  %v21_v24 = vld [vmem:[%s3691_s0 + $0x38] sm:$0xff] }
   0x9   :  { %1997 = vmatpush3.msra.mxu0 %v164_v3  ;;  %2239 = vmatpush3.msra.mxu1 %v164_v3  ;;  %v92_v23 = vld [vmem:[%s3691_s0 + $0x270] sm:$0xff]  ;;  %v93_v25 = vld [vmem:[%s3691_s0 + $0x278] sm:$0xff]  ;;  %v22_v26 = vld [vmem:[%s3691_s0 + $0x40] sm:$0xff] }
   0xa   :  { %1998 = vmatprep.subr.mxu0 %v163_v4  ;;  %2230 = vmatprep.subr.mxu1 %v163_v4  ;;  %v94_v27 = vld [vmem:[%s3691_s0 + $0x280] sm:$0xff]  ;;  %v23_v28 = vld [vmem:[%s3691_s0 + $0x48] sm:$0xff]  ;;  %v24_v30 = vld [vmem:[%s3691_s0 + $0x50] sm:$0xff] }
   0xb   :  { %1999 = vmatpush3.msra.mxu0 %v163_v4  ;;  %2240 = vmatpush3.msra.mxu1 %v163_v4  ;;  %v95_v29 = vld [vmem:[%s3691_s0 + $0x288] sm:$0xff]  ;;  %v96_v31 = vld [vmem:[%s3691_s0 + $0x290] sm:$0xff]  ;;  %v25_v32 = vld [vmem:[%s3691_s0 + $0x58] sm:$0xff] }
   0xc   :  { %2000 = vmatprep.subr.mxu0 %v162_v5  ;;  %2231 = vmatprep.subr.mxu1 %v162_v5  ;;  %v97_v33 = vld [vmem:[%s3691_s0 + $0x298] sm:$0xff]  ;;  %v26_v34 = vld [vmem:[%s3691_s0 + $0x60] sm:$0xff]  ;;  %v27_v36 = vld [vmem:[%s3691_s0 + $0x68] sm:$0xff] }
   0xd   :  { %2001 = vmatpush3.msra.mxu0 %v162_v5  ;;  %2241 = vmatpush3.msra.mxu1 %v162_v5  ;;  %v98_v35 = vld [vmem:[%s3691_s0 + $0x2a0] sm:$0xff]  ;;  %v99_v37 = vld [vmem:[%s3691_s0 + $0x2a8] sm:$0xff]  ;;  %v28_v38 = vld [vmem:[%s3691_s0 + $0x70] sm:$0xff] }
   0xe   :  { %2002 = vmatprep.subr.mxu0 %v161_v6  ;;  %2232 = vmatprep.subr.mxu1 %v161_v6  ;;  %v100_v39 = vld [vmem:[%s3691_s0 + $0x2b0] sm:$0xff]  ;;  %v29_v40 = vld [vmem:[%s3691_s0 + $0x78] sm:$0xff]  ;;  %v30_v42 = vld [vmem:[%s3691_s0 + $0x80] sm:$0xff] }
   0xf   :  { %2003 = vmatpush3.msra.mxu0 %v161_v6  ;;  %2242 = vmatpush3.msra.mxu1 %v161_v6  ;;  %v101_v41 = vld [vmem:[%s3691_s0 + $0x2b8] sm:$0xff]  ;;  %v102_v43 = vld [vmem:[%s3691_s0 + $0x2c0] sm:$0xff]  ;;  %v31_v44 = vld [vmem:[%s3691_s0 + $0x88] sm:$0xff] }
  0x10   :  { %2004 = vmatprep.subr.mxu0 %v160_v7  ;;  %2233 = vmatprep.subr.mxu1 %v160_v7  ;;  %v103_v45 = vld [vmem:[%s3691_s0 + $0x2c8] sm:$0xff]  ;;  %v32_v46 = vld [vmem:[%s3691_s0 + $0x90] sm:$0xff]  ;;  %v33_v48 = vld [vmem:[%s3691_s0 + $0x98] sm:$0xff] }
  0x11   :  { %2005 = vmatpush3.msra.mxu0 %v160_v7  ;;  %2243 = vmatpush3.msra.mxu1 %v160_v7  ;;  %v104_v47 = vld [vmem:[%s3691_s0 + $0x2d0] sm:$0xff]  ;;  %v105_v49 = vld [vmem:[%s3691_s0 + $0x2d8] sm:$0xff]  ;;  %v34_v50 = vld [vmem:[%s3691_s0 + $0xa0] sm:$0xff] }
  0x12   :  { %2006 = vmatprep.subr.mxu0 %v159_v8  ;;  %2234 = vmatprep.subr.mxu1 %v159_v8  ;;  %v106_v51 = vld [vmem:[%s3691_s0 + $0x2e0] sm:$0xff]  ;;  %v35_v52 = vld [vmem:[%s3691_s0 + $0xa8] sm:$0xff]  ;;  %v36_v54 = vld [vmem:[%s3691_s0 + $0xb0] sm:$0xff] }
  0x13   :  { %2007 = vmatpush3.msra.mxu0 %v159_v8  ;;  %2244 = vmatpush3.msra.mxu1 %v159_v8  ;;  %v107_v53 = vld [vmem:[%s3691_s0 + $0x2e8] sm:$0xff]  ;;  %v108_v55 = vld [vmem:[%s3691_s0 + $0x2f0] sm:$0xff]  ;;  %v37_v56 = vld [vmem:[%s3691_s0 + $0xb8] sm:$0xff] }
  0x14   :  { %2008 = vmatprep.subr.mxu0 %v158_v9  ;;  %2235 = vmatprep.subr.mxu1 %v158_v9  ;;  %v109_v57 = vld [vmem:[%s3691_s0 + $0x2f8] sm:$0xff]  ;;  %v38_v58 = vld [vmem:[%s3691_s0 + $0xc0] sm:$0xff]  ;;  %v39_v60 = vld [vmem:[%s3691_s0 + $0xc8] sm:$0xff] }
  0x15   :  { %2009 = vmatpush3.msra.mxu0 %v158_v9  ;;  %2245 = vmatpush3.msra.mxu1 %v158_v9  ;;  %v110_v59 = vld [vmem:[%s3691_s0 + $0x300] sm:$0xff]  ;;  %v111_v61 = vld [vmem:[%s3691_s0 + $0x308] sm:$0xff]  ;;  %v40_v62 = vld [vmem:[%s3691_s0 + $0xd0] sm:$0xff] }
  0x16   :  { %2010 = vmatprep.mubr.msk.f32.mxu0 %vm175_vm1, %v14_v10  ;;  %2118 = vmatprep.mubr.msk.f32.mxu1 %vm175_vm1, %v86_v11  ;;  %v112_v63 = vld [vmem:[%s3691_s0 + $0x310] sm:$0xff]  ;;  %v41_v0 = vld [vmem:[%s3691_s0 + $0xd8] sm:$0xff]  ;;  %v42_v2 = vld [vmem:[%s3691_s0 + $0xe0] sm:$0xff] }
  0x17   :  { %2011 = vmatmul.mubr.msk.f32.vlgmr.msra.gmra.mxu0 %vm175_vm1, %v15_v12  ;;  %2119 = vmatmul.mubr.msk.f32.vlgmr.msra.gmra.mxu1 %vm175_vm1, %v87_v13  ;;  %v113_v1 = vld [vmem:[%s3691_s0 + $0x318] sm:$0xff]  ;;  %v114_v3 = vld [vmem:[%s3691_s0 + $0x320] sm:$0xff]  ;;  %v43_v4 = vld [vmem:[%s3691_s0 + $0xe8] sm:$0xff] }
  0x18   :  { %2013 = vmatprep.mubr.msk.f32.mxu0 %vm175_vm1, %v16_v14  ;;  %2121 = vmatprep.mubr.msk.f32.mxu1 %vm175_vm1, %v88_v15  ;;  %v115_v5 = vld [vmem:[%s3691_s0 + $0x328] sm:$0xff]  ;;  %v44_v6 = vld [vmem:[%s3691_s0 + $0xf0] sm:$0xff]  ;;  %v45_v8 = vld [vmem:[%s3691_s0 + $0xf8] sm:$0xff] }
  0x19   :  { %v116_v7 = vld [vmem:[%s3691_s0 + $0x330] sm:$0xff]  ;;  %v117_v9 = vld [vmem:[%s3691_s0 + $0x338] sm:$0xff]  ;;  %v46_v10 = vld [vmem:[%s3691_s0 + $0x100] sm:$0xff] }
  0x1a   :  { %v118_v11 = vld [vmem:[%s3691_s0 + $0x340] sm:$0xff]  ;;  %v47_v12 = vld [vmem:[%s3691_s0 + $0x108] sm:$0xff]  ;;  %v48_v14 = vld [vmem:[%s3691_s0 + $0x110] sm:$0xff] }
  0x1b   :  { %2014 = vmatmul.mubr.msk.f32.gmra.mxu0 %vm175_vm1, %v17_v16  ;;  %2122 = vmatmul.mubr.msk.f32.gmra.mxu1 %vm175_vm1, %v89_v17  ;;  %v119_v13 = vld [vmem:[%s3691_s0 + $0x348] sm:$0xff]  ;;  %v120_v15 = vld [vmem:[%s3691_s0 + $0x350] sm:$0xff]  ;;  %v49_v16 = vld [vmem:[%s3691_s0 + $0x118] sm:$0xff] }
  0x1c   :  { %2016 = vmatprep.mubr.msk.f32.mxu0 %vm175_vm1, %v18_v18  ;;  %2124 = vmatprep.mubr.msk.f32.mxu1 %vm175_vm1, %v90_v19  ;;  %v121_v17 = vld [vmem:[%s3691_s0 + $0x358] sm:$0xff]  ;;  %v50_v18 = vld [vmem:[%s3691_s0 + $0x120] sm:$0xff] }
  0x1d   :  { %v122_v19 = vld [vmem:[%s3691_s0 + $0x360] sm:$0xff] }
  0x1f   :  { %2017 = vmatmul.mubr.msk.f32.gmra.mxu0 %vm175_vm1, %v19_v20  ;;  %2125 = vmatmul.mubr.msk.f32.gmra.mxu1 %vm175_vm1, %v91_v21  ;;  %v51_v20 = vld [vmem:[%s3691_s0 + $0x128] sm:$0xff] }
  0x20   :  { %2019 = vmatprep.mubr.msk.f32.mxu0 %vm175_vm1, %v20_v22  ;;  %2127 = vmatprep.mubr.msk.f32.mxu1 %vm175_vm1, %v92_v23  ;;  %v123_v21 = vld [vmem:[%s3691_s0 + $0x368] sm:$0xff]  ;;  %v52_v22 = vld [vmem:[%s3691_s0 + $0x130] sm:$0xff] }
  0x21   :  { %v124_v23 = vld [vmem:[%s3691_s0 + $0x370] sm:$0xff] }
  0x23   :  { %2020 = vmatmul.mubr.msk.f32.gmra.mxu0 %vm175_vm1, %v21_v24  ;;  %2128 = vmatmul.mubr.msk.f32.gmra.mxu1 %vm175_vm1, %v93_v25  ;;  %v53_v24 = vld [vmem:[%s3691_s0 + $0x138] sm:$0xff] }
  0x24   :  { %2022 = vmatprep.mubr.msk.f32.mxu0 %vm175_vm1, %v22_v26  ;;  %2130 = vmatprep.mubr.msk.f32.mxu1 %vm175_vm1, %v94_v27  ;;  %v125_v25 = vld [vmem:[%s3691_s0 + $0x378] sm:$0xff]  ;;  %v54_v26 = vld [vmem:[%s3691_s0 + $0x140] sm:$0xff] }
  0x25   :  { %v126_v27 = vld [vmem:[%s3691_s0 + $0x380] sm:$0xff] }
  0x27   :  { %2023 = vmatmul.mubr.msk.f32.gmra.mxu0 %vm175_vm1, %v23_v28  ;;  %2131 = vmatmul.mubr.msk.f32.gmra.mxu1 %vm175_vm1, %v95_v29  ;;  %v55_v28 = vld [vmem:[%s3691_s0 + $0x148] sm:$0xff] }
  0x28   :  { %2025 = vmatprep.mubr.msk.f32.mxu0 %vm175_vm1, %v24_v30  ;;  %2133 = vmatprep.mubr.msk.f32.mxu1 %vm175_vm1, %v96_v31  ;;  %v127_v29 = vld [vmem:[%s3691_s0 + $0x388] sm:$0xff]  ;;  %v56_v30 = vld [vmem:[%s3691_s0 + $0x150] sm:$0xff] }
  0x29   :  { %v128_v31 = vld [vmem:[%s3691_s0 + $0x390] sm:$0xff] }
  0x2b   :  { %2026 = vmatmul.mubr.msk.f32.gmra.mxu0 %vm175_vm1, %v25_v32  ;;  %2134 = vmatmul.mubr.msk.f32.gmra.mxu1 %vm175_vm1, %v97_v33  ;;  %v57_v32 = vld [vmem:[%s3691_s0 + $0x158] sm:$0xff] }
  0x2c   :  { %2028 = vmatprep.mubr.msk.f32.mxu0 %vm175_vm1, %v26_v34  ;;  %2136 = vmatprep.mubr.msk.f32.mxu1 %vm175_vm1, %v98_v35  ;;  %v129_v33 = vld [vmem:[%s3691_s0 + $0x398] sm:$0xff]  ;;  %v58_v34 = vld [vmem:[%s3691_s0 + $0x160] sm:$0xff] }
  0x2d   :  { %v130_v35 = vld [vmem:[%s3691_s0 + $0x3a0] sm:$0xff] }
  0x2f   :  { %2029 = vmatmul.mubr.msk.f32.gmra.mxu0 %vm175_vm1, %v27_v36  ;;  %2137 = vmatmul.mubr.msk.f32.gmra.mxu1 %vm175_vm1, %v99_v37  ;;  %v59_v36 = vld [vmem:[%s3691_s0 + $0x168] sm:$0xff] }
  0x30   :  { %2031 = vmatprep.mubr.msk.f32.mxu0 %vm175_vm1, %v28_v38  ;;  %2139 = vmatprep.mubr.msk.f32.mxu1 %vm175_vm1, %v100_v39  ;;  %v131_v37 = vld [vmem:[%s3691_s0 + $0x3a8] sm:$0xff]  ;;  %v60_v38 = vld [vmem:[%s3691_s0 + $0x170] sm:$0xff] }
  0x31   :  { %v132_v39 = vld [vmem:[%s3691_s0 + $0x3b0] sm:$0xff] }
  0x33   :  { %2032 = vmatmul.mubr.msk.f32.gmra.mxu0 %vm175_vm1, %v29_v40  ;;  %2140 = vmatmul.mubr.msk.f32.gmra.mxu1 %vm175_vm1, %v101_v41  ;;  %v61_v40 = vld [vmem:[%s3691_s0 + $0x178] sm:$0xff] }
  0x34   :  { %2034 = vmatprep.mubr.msk.f32.mxu0 %vm175_vm1, %v30_v42  ;;  %2142 = vmatprep.mubr.msk.f32.mxu1 %vm175_vm1, %v102_v43  ;;  %v133_v41 = vld [vmem:[%s3691_s0 + $0x3b8] sm:$0xff]  ;;  %v62_v42 = vld [vmem:[%s3691_s0 + $0x180] sm:$0xff] }
  0x35   :  { %v134_v43 = vld [vmem:[%s3691_s0 + $0x3c0] sm:$0xff] }
  0x37   :  { %2035 = vmatmul.mubr.msk.f32.gmra.mxu0 %vm175_vm1, %v31_v44  ;;  %2143 = vmatmul.mubr.msk.f32.gmra.mxu1 %vm175_vm1, %v103_v45  ;;  %v63_v44 = vld [vmem:[%s3691_s0 + $0x188] sm:$0xff] }
  0x38   :  { %2037 = vmatprep.mubr.msk.f32.mxu0 %vm175_vm1, %v32_v46  ;;  %2145 = vmatprep.mubr.msk.f32.mxu1 %vm175_vm1, %v104_v47  ;;  %v135_v45 = vld [vmem:[%s3691_s0 + $0x3c8] sm:$0xff]  ;;  %v64_v46 = vld [vmem:[%s3691_s0 + $0x190] sm:$0xff] }
  0x39   :  { %v136_v47 = vld [vmem:[%s3691_s0 + $0x3d0] sm:$0xff] }
  0x3b   :  { %2038 = vmatmul.mubr.msk.f32.gmra.mxu0 %vm175_vm1, %v33_v48  ;;  %2146 = vmatmul.mubr.msk.f32.gmra.mxu1 %vm175_vm1, %v105_v49  ;;  %v65_v48 = vld [vmem:[%s3691_s0 + $0x198] sm:$0xff] }
  0x3c   :  { %2040 = vmatprep.mubr.msk.f32.mxu0 %vm175_vm1, %v34_v50  ;;  %2148 = vmatprep.mubr.msk.f32.mxu1 %vm175_vm1, %v106_v51  ;;  %v137_v49 = vld [vmem:[%s3691_s0 + $0x3d8] sm:$0xff]  ;;  %v66_v50 = vld [vmem:[%s3691_s0 + $0x1a0] sm:$0xff] }
  0x3d   :  { %v138_v51 = vld [vmem:[%s3691_s0 + $0x3e0] sm:$0xff] }
  0x3f   :  { %2041 = vmatmul.mubr.msk.f32.gmra.mxu0 %vm175_vm1, %v35_v52  ;;  %2149 = vmatmul.mubr.msk.f32.gmra.mxu1 %vm175_vm1, %v107_v53  ;;  %v67_v52 = vld [vmem:[%s3691_s0 + $0x1a8] sm:$0xff] }
  0x40   :  { %2043 = vmatprep.mubr.msk.f32.mxu0 %vm175_vm1, %v36_v54  ;;  %2151 = vmatprep.mubr.msk.f32.mxu1 %vm175_vm1, %v108_v55  ;;  %v139_v53 = vld [vmem:[%s3691_s0 + $0x3e8] sm:$0xff]  ;;  %v68_v54 = vld [vmem:[%s3691_s0 + $0x1b0] sm:$0xff] }
  0x41   :  { %v140_v55 = vld [vmem:[%s3691_s0 + $0x3f0] sm:$0xff] }
  0x43   :  { %2044 = vmatmul.mubr.msk.f32.gmra.mxu0 %vm175_vm1, %v37_v56  ;;  %2152 = vmatmul.mubr.msk.f32.gmra.mxu1 %vm175_vm1, %v109_v57  ;;  %v69_v56 = vld [vmem:[%s3691_s0 + $0x1b8] sm:$0xff] }
  0x44   :  { %2046 = vmatprep.mubr.msk.f32.mxu0 %vm175_vm1, %v38_v58  ;;  %2154 = vmatprep.mubr.msk.f32.mxu1 %vm175_vm1, %v110_v59  ;;  %v141_v57 = vld [vmem:[%s3691_s0 + $0x3f8] sm:$0xff]  ;;  %v70_v58 = vld [vmem:[%s3691_s0 + $0x1c0] sm:$0xff] }
  0x45   :  { %v142_v59 = vld [vmem:[%s3691_s0 + $0x400] sm:$0xff] }
  0x47   :  { %2047 = vmatmul.mubr.msk.f32.gmra.mxu0 %vm175_vm1, %v39_v60  ;;  %2155 = vmatmul.mubr.msk.f32.gmra.mxu1 %vm175_vm1, %v111_v61  ;;  %v71_v60 = vld [vmem:[%s3691_s0 + $0x1c8] sm:$0xff] }
  0x48   :  { %2049 = vmatprep.mubr.msk.f32.mxu0 %vm175_vm1, %v40_v62  ;;  %2157 = vmatprep.mubr.msk.f32.mxu1 %vm175_vm1, %v112_v63  ;;  %v143_v61 = vld [vmem:[%s3691_s0 + $0x408] sm:$0xff]  ;;  %v72_v62 = vld [vmem:[%s3691_s0 + $0x1d0] sm:$0xff] }
  0x49   :  { %v144_v63 = vld [vmem:[%s3691_s0 + $0x410] sm:$0xff] }
  0x4b   :  { %2050 = vmatmul.mubr.msk.f32.gmra.mxu0 %vm175_vm1, %v41_v0  ;;  %2158 = vmatmul.mubr.msk.f32.gmra.mxu1 %vm175_vm1, %v113_v1  ;;  %v73_v0 = vld [vmem:[%s3691_s0 + $0x1d8] sm:$0xff] }
  0x4c   :  { %2052 = vmatprep.mubr.msk.f32.mxu0 %vm175_vm1, %v42_v2  ;;  %2160 = vmatprep.mubr.msk.f32.mxu1 %vm175_vm1, %v114_v3  ;;  %v145_v1 = vld [vmem:[%s3691_s0 + $0x418] sm:$0xff]  ;;  %v74_v2 = vld [vmem:[%s3691_s0 + $0x1e0] sm:$0xff] }
  0x4d   :  { %v146_v3 = vld [vmem:[%s3691_s0 + $0x420] sm:$0xff] }
  0x4f   :  { %2053 = vmatmul.mubr.msk.f32.gmra.mxu0 %vm175_vm1, %v43_v4  ;;  %2161 = vmatmul.mubr.msk.f32.gmra.mxu1 %vm175_vm1, %v115_v5  ;;  %v75_v4 = vld [vmem:[%s3691_s0 + $0x1e8] sm:$0xff] }
  0x50   :  { %2055 = vmatprep.mubr.msk.f32.mxu0 %vm175_vm1, %v44_v6  ;;  %2163 = vmatprep.mubr.msk.f32.mxu1 %vm175_vm1, %v116_v7  ;;  %v147_v5 = vld [vmem:[%s3691_s0 + $0x428] sm:$0xff]  ;;  %v76_v6 = vld [vmem:[%s3691_s0 + $0x1f0] sm:$0xff] }
  0x51   :  { %v148_v7 = vld [vmem:[%s3691_s0 + $0x430] sm:$0xff] }
  0x53   :  { %2056 = vmatmul.mubr.msk.f32.gmra.mxu0 %vm175_vm1, %v45_v8  ;;  %2164 = vmatmul.mubr.msk.f32.gmra.mxu1 %vm175_vm1, %v117_v9  ;;  %v77_v8 = vld [vmem:[%s3691_s0 + $0x1f8] sm:$0xff] }
  0x54   :  { %2058 = vmatprep.mubr.msk.f32.mxu0 %vm175_vm1, %v46_v10  ;;  %2166 = vmatprep.mubr.msk.f32.mxu1 %vm175_vm1, %v118_v11  ;;  %v149_v9 = vld [vmem:[%s3691_s0 + $0x438] sm:$0xff]  ;;  %v78_v10 = vld [vmem:[%s3691_s0 + $0x200] sm:$0xff] }
  0x55   :  { %v150_v11 = vld [vmem:[%s3691_s0 + $0x440] sm:$0xff] }
  0x57   :  { %2059 = vmatmul.mubr.msk.f32.gmra.mxu0 %vm175_vm1, %v47_v12  ;;  %2167 = vmatmul.mubr.msk.f32.gmra.mxu1 %vm175_vm1, %v119_v13  ;;  %v79_v12 = vld [vmem:[%s3691_s0 + $0x208] sm:$0xff] }
  0x58   :  { %2061 = vmatprep.mubr.msk.f32.mxu0 %vm175_vm1, %v48_v14  ;;  %2169 = vmatprep.mubr.msk.f32.mxu1 %vm175_vm1, %v120_v15  ;;  %v151_v13 = vld [vmem:[%s3691_s0 + $0x448] sm:$0xff]  ;;  %v80_v14 = vld [vmem:[%s3691_s0 + $0x210] sm:$0xff] }
  0x59   :  { %v152_v15 = vld [vmem:[%s3691_s0 + $0x450] sm:$0xff] }
  0x5b   :  { %2062 = vmatmul.mubr.msk.f32.gmra.mxu0 %vm175_vm1, %v49_v16  ;;  %2170 = vmatmul.mubr.msk.f32.gmra.mxu1 %vm175_vm1, %v121_v17  ;;  %v81_v16 = vld [vmem:[%s3691_s0 + $0x218] sm:$0xff] }
  0x5c   :  { %2064 = vmatprep.mubr.msk.f32.mxu0 %vm175_vm1, %v50_v18  ;;  %2172 = vmatprep.mubr.msk.f32.mxu1 %vm175_vm1, %v122_v19  ;;  %v153_v17 = vld [vmem:[%s3691_s0 + $0x458] sm:$0xff]  ;;  %v82_v18 = vld [vmem:[%s3691_s0 + $0x220] sm:$0xff] }
  0x5d   :  { %v154_v19 = vld [vmem:[%s3691_s0 + $0x460] sm:$0xff] }
  0x5f   :  { %2065 = vmatmul.mubr.msk.f32.gmra.mxu0 %vm175_vm1, %v51_v20  ;;  %2173 = vmatmul.mubr.msk.f32.gmra.mxu1 %vm175_vm1, %v123_v21  ;;  %v83_v20 = vld [vmem:[%s3691_s0 + $0x228] sm:$0xff] }
  0x60   :  { %2067 = vmatprep.mubr.msk.f32.mxu0 %vm175_vm1, %v52_v22  ;;  %2175 = vmatprep.mubr.msk.f32.mxu1 %vm175_vm1, %v124_v23  ;;  %v155_v21 = vld [vmem:[%s3691_s0 + $0x468] sm:$0xff]  ;;  %v84_v22 = vld [vmem:[%s3691_s0 + $0x230] sm:$0xff] }
  0x61   :  { %v156_v23 = vld [vmem:[%s3691_s0 + $0x470] sm:$0xff] }
  0x63   :  { %2068 = vmatmul.mubr.msk.f32.gmra.mxu0 %vm175_vm1, %v53_v24  ;;  %2176 = vmatmul.mubr.msk.f32.gmra.mxu1 %vm175_vm1, %v125_v25  ;;  %v85_v24 = vld [vmem:[%s3691_s0 + $0x238] sm:$0xff] }
  0x64   :  { %2070 = vmatprep.mubr.msk.f32.mxu0 %vm175_vm1, %v54_v26  ;;  %2178 = vmatprep.mubr.msk.f32.mxu1 %vm175_vm1, %v126_v27  ;;  %v157_v25 = vld [vmem:[%s3691_s0 + $0x478] sm:$0xff] }
  0x67   :  { %2071 = vmatmul.mubr.msk.f32.gmra.mxu0 %vm175_vm1, %v55_v28  ;;  %2179 = vmatmul.mubr.msk.f32.gmra.mxu1 %vm175_vm1, %v127_v29 }
  0x68   :  { %2073 = vmatprep.mubr.msk.f32.mxu0 %vm175_vm1, %v56_v30  ;;  %2181 = vmatprep.mubr.msk.f32.mxu1 %vm175_vm1, %v128_v31 }
  0x6b   :  { %2074 = vmatmul.mubr.msk.f32.gmra.mxu0 %vm175_vm1, %v57_v32  ;;  %2182 = vmatmul.mubr.msk.f32.gmra.mxu1 %vm175_vm1, %v129_v33 }
  0x6c   :  { %2076 = vmatprep.mubr.msk.f32.mxu0 %vm175_vm1, %v58_v34  ;;  %2184 = vmatprep.mubr.msk.f32.mxu1 %vm175_vm1, %v130_v35 }
  0x6f   :  { %2077 = vmatmul.mubr.msk.f32.gmra.mxu0 %vm175_vm1, %v59_v36  ;;  %2185 = vmatmul.mubr.msk.f32.gmra.mxu1 %vm175_vm1, %v131_v37 }
  0x70   :  { %2079 = vmatprep.mubr.msk.f32.mxu0 %vm175_vm1, %v60_v38  ;;  %2187 = vmatprep.mubr.msk.f32.mxu1 %vm175_vm1, %v132_v39 }
  0x73   :  { %2080 = vmatmul.mubr.msk.f32.gmra.mxu0 %vm175_vm1, %v61_v40  ;;  %2188 = vmatmul.mubr.msk.f32.gmra.mxu1 %vm175_vm1, %v133_v41 }
  0x74   :  { %2082 = vmatprep.mubr.msk.f32.mxu0 %vm175_vm1, %v62_v42  ;;  %2190 = vmatprep.mubr.msk.f32.mxu1 %vm175_vm1, %v134_v43 }
  0x77   :  { %2083 = vmatmul.mubr.msk.f32.gmra.mxu0 %vm175_vm1, %v63_v44  ;;  %2191 = vmatmul.mubr.msk.f32.gmra.mxu1 %vm175_vm1, %v135_v45 }
  0x78   :  { %2085 = vmatprep.mubr.msk.f32.mxu0 %vm175_vm1, %v64_v46  ;;  %2193 = vmatprep.mubr.msk.f32.mxu1 %vm175_vm1, %v136_v47 }
  0x7b   :  { %2086 = vmatmul.mubr.msk.f32.gmra.mxu0 %vm175_vm1, %v65_v48  ;;  %2194 = vmatmul.mubr.msk.f32.gmra.mxu1 %vm175_vm1, %v137_v49 }
  0x7c   :  { %2088 = vmatprep.mubr.msk.f32.mxu0 %vm175_vm1, %v66_v50  ;;  %2196 = vmatprep.mubr.msk.f32.mxu1 %vm175_vm1, %v138_v51 }
  0x7f   :  { %2089 = vmatmul.mubr.msk.f32.gmra.mxu0 %vm175_vm1, %v67_v52  ;;  %2197 = vmatmul.mubr.msk.f32.gmra.mxu1 %vm175_vm1, %v139_v53 }
  0x80   :  { %2091 = vmatprep.mubr.msk.f32.mxu0 %vm175_vm1, %v68_v54  ;;  %2199 = vmatprep.mubr.msk.f32.mxu1 %vm175_vm1, %v140_v55 }
  0x83   :  { %2092 = vmatmul.mubr.msk.f32.gmra.mxu0 %vm175_vm1, %v69_v56  ;;  %2200 = vmatmul.mubr.msk.f32.gmra.mxu1 %vm175_vm1, %v141_v57 }
  0x84   :  { %2094 = vmatprep.mubr.msk.f32.mxu0 %vm175_vm1, %v70_v58  ;;  %2202 = vmatprep.mubr.msk.f32.mxu1 %vm175_vm1, %v142_v59 }
  0x87   :  { %2095 = vmatmul.mubr.msk.f32.gmra.mxu0 %vm175_vm1, %v71_v60  ;;  %2203 = vmatmul.mubr.msk.f32.gmra.mxu1 %vm175_vm1, %v143_v61 }
  0x88   :  { %2097 = vmatprep.mubr.msk.f32.mxu0 %vm175_vm1, %v72_v62  ;;  %2205 = vmatprep.mubr.msk.f32.mxu1 %vm175_vm1, %v144_v63 }
  0x8b   :  { %2098 = vmatmul.mubr.msk.f32.gmra.mxu0 %vm175_vm1, %v73_v0  ;;  %2206 = vmatmul.mubr.msk.f32.gmra.mxu1 %vm175_vm1, %v145_v1 }
  0x8c   :  { %2100 = vmatprep.mubr.msk.f32.mxu0 %vm175_vm1, %v74_v2  ;;  %2208 = vmatprep.mubr.msk.f32.mxu1 %vm175_vm1, %v146_v3 }
  0x8f   :  { %2101 = vmatmul.mubr.msk.f32.gmra.mxu0 %vm175_vm1, %v75_v4  ;;  %2209 = vmatmul.mubr.msk.f32.gmra.mxu1 %vm175_vm1, %v147_v5 }
  0x90   :  { %2103 = vmatprep.mubr.msk.f32.mxu0 %vm175_vm1, %v76_v6  ;;  %2211 = vmatprep.mubr.msk.f32.mxu1 %vm175_vm1, %v148_v7  ;;  %v2940_v6 = vld [vmem:[%s3692_s2] ss:$0 sm:$0xff] }
  0x93   :  { %2104 = vmatmul.mubr.msk.f32.gmra.mxu0 %vm175_vm1, %v77_v8  ;;  %2212 = vmatmul.mubr.msk.f32.gmra.mxu1 %vm175_vm1, %v149_v9 }
  0x94   :  { %2106 = vmatprep.mubr.msk.f32.mxu0 %vm175_vm1, %v78_v10  ;;  %2214 = vmatprep.mubr.msk.f32.mxu1 %vm175_vm1, %v150_v11 }
  0x97   :  { %2107 = vmatmul.mubr.msk.f32.gmra.mxu0 %vm175_vm1, %v79_v12  ;;  %2215 = vmatmul.mubr.msk.f32.gmra.mxu1 %vm175_vm1, %v151_v13 }
  0x98   :  { %2109 = vmatprep.mubr.msk.f32.mxu0 %vm175_vm1, %v80_v14  ;;  %2217 = vmatprep.mubr.msk.f32.mxu1 %vm175_vm1, %v152_v15 }
  0x9b   :  { %2110 = vmatmul.mubr.msk.f32.gmra.mxu0 %vm175_vm1, %v81_v16  ;;  %2218 = vmatmul.mubr.msk.f32.gmra.mxu1 %vm175_vm1, %v153_v17 }
  0x9c   :  { %2112 = vmatprep.mubr.msk.f32.mxu0 %vm175_vm1, %v82_v18  ;;  %2220 = vmatprep.mubr.msk.f32.mxu1 %vm175_vm1, %v154_v19 }
  0x9f   :  { %2113 = vmatmul.mubr.msk.f32.gmra.mxu0 %vm175_vm1, %v83_v20  ;;  %2221 = vmatmul.mubr.msk.f32.gmra.mxu1 %vm175_vm1, %v155_v21 }
  0xa0   :  { %2115 = vmatprep.mubr.msk.f32.mxu0 %vm175_vm1, %v84_v22  ;;  %2223 = vmatprep.mubr.msk.f32.mxu1 %vm175_vm1, %v156_v23 }
  0xa3   :  { %2116 = vmatmul.mubr.msk.f32.gmra.mxu0 %vm175_vm1, %v85_v24  ;;  %2224 = vmatmul.mubr.msk.f32.gmra.mxu1 %vm175_vm1, %v157_v25 }
  0xd7   :  { %v2012_v26 = vpop.f32.mrf.mxu0  ;;  %v2120_v27 = vpop.f32.mrf.mxu1 }
  0xd8   :  { %v2947_v9 = vadd.f32 %v2012_v26, %v2940_v6  ;;  %v2954_v12 = vadd.f32 %v2120_v27, %v2940_v6 }
  0xd9   :  { %v678_v28 = vpop.f32.mrf.mxu0  ;;  %v1038_v29 = vpop.f32.mrf.mxu1 }
  0xda   :  { %v2957_v13 = vadd.f32 %v2940_v6, %v678_v28  ;;  %v2960_v14 = vadd.f32 %v2940_v6, %v1038_v29 }
  0xdb   :  { %v2015_v30 = vpop.f32.mrf.mxu0  ;;  %v2123_v31 = vpop.f32.mrf.mxu1 }
  0xdc   :  { %v2963_v15 = vadd.f32 %v2015_v30, %v2940_v6  ;;  %v2970_v18 = vadd.f32 %v2123_v31, %v2940_v6 }
  0xdd   :  { %v688_v32 = vpop.f32.mrf.mxu0  ;;  %v1048_v33 = vpop.f32.mrf.mxu1 }
  0xde   :  { %v2973_v19 = vadd.f32 %v2940_v6, %v688_v32  ;;  %v2977_v21 = vadd.f32 %v2940_v6, %v1048_v33 }
  0xdf   :  { %v2018_v34 = vpop.f32.mrf.mxu0  ;;  %v2126_v35 = vpop.f32.mrf.mxu1 }
  0xe0   :  { %v2984_v24 = vadd.f32 %v2018_v34, %v2940_v6  ;;  %v2987_v25 = vadd.f32 %v2126_v35, %v2940_v6 }
  0xe1   :  { %v698_v36 = vpop.f32.mrf.mxu0  ;;  %v1058_v37 = vpop.f32.mrf.mxu1 }
  0xe2   :  { %v2990_v26 = vadd.f32 %v2940_v6, %v698_v36  ;;  %v2993_v27 = vadd.f32 %v2940_v6, %v1058_v37 }
  0xe3   :  { %v2873_v38 = vpop.f32.mrf.mxu0  ;;  %v2875_v39 = vpop.f32.mrf.mxu1 }
  0xe4   :  { %3708 = vst [vmem:[#allocation2_spill] sm:$0xff] %v2990_v26  ;;  %3709 = vst [vmem:[#allocation3_spill] sm:$0xff] %v2993_v27  ;;  %v3007_v36 = vadd.f32 %v2873_v38, %v2940_v6  ;;  %v3011_v37 = vadd.f32 %v2875_v39, %v2940_v6 }
  0xe5   :  { %v2877_v40 = vpop.f32.mrf.mxu0  ;;  %v2879_v41 = vpop.f32.mrf.mxu1 }
  0xe6   :  { %v3016_v31 = vadd.f32 %v2940_v6, %v2877_v40  ;;  %v3020_v29 = vadd.f32 %v2940_v6, %v2879_v41 }
  0xe7   :  { %v2881_v42 = vpop.f32.mrf.mxu0  ;;  %v2883_v43 = vpop.f32.mrf.mxu1 }
  0xe8   :  { %v3024_v35 = vadd.f32 %v2881_v42, %v2940_v6  ;;  %v3036_v41 = vadd.f32 %v2883_v43, %v2940_v6 }
  0xe9   :  { %v2885_v44 = vpop.f32.mrf.mxu0  ;;  %v2887_v45 = vpop.f32.mrf.mxu1 }
  0xea   :  { %3710 = vst [vmem:[#allocation4_spill] sm:$0xff] %v3024_v35  ;;  %v3040_v42 = vadd.f32 %v2940_v6, %v2885_v44  ;;  %v3044_v20 = vadd.f32 %v2940_v6, %v2887_v45 }
  0xeb   :  { %v2889_v46 = vpop.f32.mrf.mxu0  ;;  %v2891_v47 = vpop.f32.mrf.mxu1 }
  0xec   :  { %v3048_v39 = vadd.f32 %v2889_v46, %v2940_v6  ;;  %v3058_v44 = vadd.f32 %v2891_v47, %v2940_v6 }
  0xed   :  { %v2893_v48 = vpop.f32.mrf.mxu0  ;;  %v2895_v49 = vpop.f32.mrf.mxu1 }
  0xee   :  { %v3062_v45 = vadd.f32 %v2940_v6, %v2893_v48 }
  0xef   :  { %v2897_v50 = vpop.f32.mrf.mxu0  ;;  %v2899_v51 = vpop.f32.mrf.mxu1 }
  0xf0   :  { %v3077_v47 = vadd.f32 %v2897_v50, %v2940_v6  ;;  %v3081_v48 = vadd.f32 %v2899_v51, %v2940_v6 }
  0xf1   :  { %v2901_v52 = vpop.f32.mrf.mxu0  ;;  %v2903_v53 = vpop.f32.mrf.mxu1 }
  0xf2   :  { %v3085_v46 = vadd.f32 %v2940_v6, %v2901_v52 }
  0xf3   :  { %v2905_v54 = vpop.f32.mrf.mxu0  ;;  %v2907_v55 = vpop.f32.mrf.mxu1 }
  0xf4   :  { %v3107_v26 = vadd.f32 %v2907_v55, %v2940_v6 }
  0xf5   :  { %v2909_v56 = vpop.f32.mrf.mxu0  ;;  %v2911_v57 = vpop.f32.mrf.mxu1 }
  0xf6   :  { %v3112_v50 = vadd.f32 %v2940_v6, %v2909_v56  ;;  %v3116_v27 = vadd.f32 %v2940_v6, %v2911_v57 }
  0xf7   :  { %v2913_v58 = vpop.f32.mrf.mxu0  ;;  %v2915_v59 = vpop.f32.mrf.mxu1 }
  0xf8   :  { %v3120_v52 = vadd.f32 %v2913_v58, %v2940_v6  ;;  %v3132_v57 = vadd.f32 %v2915_v59, %v2940_v6 }
  0xf9   :  { %v2917_v60 = vpop.f32.mrf.mxu0  ;;  %v2919_v61 = vpop.f32.mrf.mxu1 }
  0xfa   :  { %3715 = vst [vmem:[#allocation9_spill] sm:$0xff] %v3120_v52  ;;  %v3136_v58 = vadd.f32 %v2940_v6, %v2917_v60 }
  0xfb   :  { %v2921_v62 = vpop.f32.mrf.mxu0  ;;  %v2923_v63 = vpop.f32.mrf.mxu1 }
  0xfc   :  { %v3144_v55 = vadd.f32 %v2921_v62, %v2940_v6  ;;  %v3154_v60 = vadd.f32 %v2923_v63, %v2940_v6 }
  0xfd   :  { %v2925_v0 = vpop.f32.mrf.mxu0  ;;  %v2927_v1 = vpop.f32.mrf.mxu1 }
  0xff   :  { %v2929_v2 = vpop.f32.mrf.mxu0  ;;  %v2931_v3 = vpop.f32.mrf.mxu1 }
 0x100   :  { %v3173_v63 = vadd.f32 %v2929_v2, %v2940_v6 }
 0x101   :  { %v2933_v4 = vpop.f32.mrf.mxu0  ;;  %v2935_v5 = vpop.f32.mrf.mxu1 }
 0x102   :  { %3722 = vst [vmem:[#allocation16_spill] sm:$0xff] %v3173_v63  ;;  %v3181_v62 = vadd.f32 %v2940_v6, %v2933_v4 }
 0x103   :  { %v2942_v7 = vpop.f32.mrf.mxu0  ;;  %v2944_v8 = vpop.f32.mrf.mxu1 }
 0x104   :  { %3724 = vst [vmem:[#allocation18_spill] sm:$0xff] %v3181_v62 }
 0x105   :  { %v2949_v10 = vpop.f32.mrf.mxu0  ;;  %v2951_v11 = vpop.f32.mrf.mxu1 }
 0x106   :  { %v3208_v2 = vadd.f32 %v2940_v6, %v2949_v10 }
 0x107   :  { %v2965_v16 = vpop.f32.mrf.mxu0  ;;  %v2967_v17 = vpop.f32.mrf.mxu1 }
 0x108   :  { %3729 = vst [vmem:[#allocation23_spill] sm:$0xff] %v3208_v2  ;;  %v3216_v4 = vadd.f32 %v2965_v16, %v2940_v6 }
 0x109   :  { %v2979_v22 = vpop.f32.mrf.mxu0  ;;  %v2981_v23 = vpop.f32.mrf.mxu1 }
 0x10a   :  { %3731 = vst [vmem:[#allocation25_spill] sm:$0xff] %v3216_v4  ;;  %v3232_v16 = vadd.f32 %v2940_v6, %v2979_v22 }
 0x10b   :  { %v2999_v32 = vpop.f32.mrf.mxu0  ;;  %v3001_v33 = vpop.f32.mrf.mxu1 }
 0x10d   :  { %v3026_v38 = vpop.f32.mrf.mxu0  ;;  %v3028_v34 = vpop.f32.mrf.mxu1 }
 0x10f   :  { %v3050_v30 = vpop.f32.mrf.mxu0  ;;  %v3052_v28 = vpop.f32.mrf.mxu1 }
 0x110   :  { %3711 = vst [vmem:[#allocation5_spill] sm:$0xff] %v3052_v28  ;;  %v3069_v28 = vadd.f32 %v2940_v6, %v2895_v49  ;;  %v3089_v49 = vadd.f32 %v2940_v6, %v2903_v53  ;;  %v3103_v53 = vadd.f32 %v2905_v54, %v2940_v6 }
 0x111   :  { %v3071_v40 = vpop.f32.mrf.mxu0  ;;  %v3073_v43 = vpop.f32.mrf.mxu1 }
 0x112   :  { %3712 = vst [vmem:[#allocation6_spill] sm:$0xff] %v3071_v40  ;;  %3713 = vst [vmem:[#allocation7_spill] sm:$0xff] %v3073_v43 }
 0x113   :  { %v3095_v40 = vpop.f32.mrf.mxu0  ;;  %v3097_v51 = vpop.f32.mrf.mxu1 }
 0x114   :  { %3714 = vst [vmem:[#allocation8_spill] sm:$0xff] %v3097_v51 }
 0x115   :  { %v3122_v54 = vpop.f32.mrf.mxu0  ;;  %v3124_v35 = vpop.f32.mrf.mxu1 }
 0x116   :  { %3716 = vst [vmem:[#allocation10_spill] sm:$0xff] %v3122_v54  ;;  %3717 = vst [vmem:[#allocation11_spill] sm:$0xff] %v3124_v35  ;;  %v3140_v54 = vadd.f32 %v2940_v6, %v2919_v61  ;;  %v3158_v61 = vadd.f32 %v2940_v6, %v2925_v0  ;;  %v3177_v0 = vadd.f32 %v2931_v3, %v2940_v6 }
 0x117   :  { %v3146_v43 = vpop.f32.mrf.mxu0  ;;  %v3148_v51 = vpop.f32.mrf.mxu1  ;;  %v3212_v35 = vadd.f32 %v2940_v6, %v2951_v11  ;;  %v3228_v11 = vadd.f32 %v2967_v17, %v2940_v6 }
 0x118   :  { %3718 = vst [vmem:[#allocation12_spill] sm:$0xff] %v3146_v43  ;;  %3719 = vst [vmem:[#allocation13_spill] sm:$0xff] %v3148_v51  ;;  %v3165_v51 = vadd.f32 %v2940_v6, %v2927_v1  ;;  %v3185_v1 = vadd.f32 %v2940_v6, %v2935_v5  ;;  %v3199_v5 = vadd.f32 %v2942_v7, %v2940_v6 }
 0x119   :  { %v3167_v56 = vpop.f32.mrf.mxu0  ;;  %v3169_v59 = vpop.f32.mrf.mxu1  ;;  %3723 = vst [vmem:[#allocation17_spill] sm:$0xff] %v3177_v0  ;;  %v3203_v43 = vadd.f32 %v2944_v8, %v2940_v6  ;;  %3730 = vst [vmem:[#allocation24_spill] sm:$0xff] %v3212_v35  ;;  %v3240_v8 = vadd.f32 %v2999_v32, %v2940_v6  ;;  %v3251_v32 = vadd.f32 %v3001_v33, %v2940_v6  ;;  %v3736_v33 = vmax.f32 %v2947_v9, 0.0 }
 0x11a   :  { %3720 = vst [vmem:[#allocation14_spill] sm:$0xff] %v3167_v56  ;;  %3721 = vst [vmem:[#allocation15_spill] sm:$0xff] %v3169_v59  ;;  %v3738_v9 = vmax.f32 %v2957_v13, 0.0 }
 0x11b   :  { %3725 = vst [vmem:[#allocation19_spill] sm:$0xff] %v3185_v1  ;;  %v3191_v56 = vpop.f32.mrf.mxu0  ;;  %v3193_v3 = vpop.f32.mrf.mxu1  ;;  %3728 = vst [vmem:[#allocation22_spill] sm:$0xff] %v3203_v43 }
 0x11c   :  { %3726 = vst [vmem:[#allocation20_spill] sm:$0xff] %v3191_v56  ;;  %3727 = vst [vmem:[#allocation21_spill] sm:$0xff] %v3193_v3 }
 0x11d   :  { %v3218_v7 = vpop.f32.mrf.mxu0  ;;  %v3220_v52 = vpop.f32.mrf.mxu1  ;;  %3735 = vst [vmem:[#allocation29_spill] sm:$0xff] %v3240_v8 }
 0x11e   :  { %3732 = vst [vmem:[#allocation26_spill] sm:$0xff] %v3218_v7  ;;  %3733 = vst [vmem:[#allocation27_spill] sm:$0xff] %v3220_v52  ;;  %v3236_v52 = vadd.f32 %v2940_v6, %v2981_v23 }
 0x11f   :  { %v2066_v59 = vpop.f32.mrf.mxu0  ;;  %v2174_v10 = vpop.f32.mrf.mxu1 }
 0x120   :  { %3734 = vst [vmem:[#allocation28_spill] sm:$0xff] %v3236_v52  ;;  %v864_v17 = vadd.f32 %v2066_v59, %v2940_v6  ;;  %v1224_v56 = vadd.f32 %v2174_v10, %v2940_v6  ;;  %v3266_v10 = vadd.f32 %v2940_v6, %v3026_v38 }
 0x121   :  { %v858_v62 = vpop.f32.mrf.mxu0  ;;  %v1218_v0 = vpop.f32.mrf.mxu1 }
 0x122   :  { %v1434_v63 = vmax.f32 %v864_v17, 0.0  ;;  %v1506_v3 = vmax.f32 %v1224_v56, 0.0  ;;  %v859_v7 = vadd.f32 %v2940_v6, %v858_v62  ;;  %v1219_v59 = vadd.f32 %v2940_v6, %v1218_v0 }
 0x123   :  { %v2069_v4 = vpop.f32.mrf.mxu0  ;;  %v2177_v35 = vpop.f32.mrf.mxu1  ;;  %v3737_v17 = vmax.f32 %v2954_v12, 0.0  ;;  %v1496_v0 = vmax.f32 %v3251_v32, 0.0  ;;  %v3739_v12 = vmax.f32 %v2960_v14, 0.0 }
 0x124   :  { %v1542_v2 = vmax.f32 %v3736_v33, %v1434_v63  ;;  %v1433_v43 = vmax.f32 %v859_v7, 0.0  ;;  %v1505_v62 = vmax.f32 %v1219_v59, 0.0  ;;  %v874_v1 = vadd.f32 %v2069_v4, %v2940_v6 }
 0x125   :  { %v1578_v56 = vmax.f32 %v3737_v17, %v1506_v3  ;;  %v1234_v23 = vadd.f32 %v2177_v35, %v2940_v6  ;;  %v868_v22 = vpop.f32.mrf.mxu0  ;;  %v1228_v8 = vpop.f32.mrf.mxu1  ;;  %v3277_v59 = vadd.f32 %v2940_v6, %v3028_v34  ;;  %v1423_v34 = vmax.f32 %v3266_v10, 0.0 }
 0x126   :  { %v1541_v63 = vmax.f32 %v3738_v9, %v1433_v43  ;;  %v1577_v3 = vmax.f32 %v3739_v12, %v1505_v62  ;;  %v869_v7 = vadd.f32 %v2940_v6, %v868_v22  ;;  %v1436_v38 = vmax.f32 %v874_v1, 0.0 }
 0x127   :  { %v1614_v52 = vmax.f32 %v1542_v2, %v1578_v56  ;;  %v1508_v33 = vmax.f32 %v1234_v23, 0.0  ;;  %v1229_v4 = vadd.f32 %v2940_v6, %v1228_v8  ;;  %v2072_v35 = vpop.f32.mrf.mxu0  ;;  %v2180_v17 = vpop.f32.mrf.mxu1  ;;  %v3740_v1 = vmax.f32 %v2963_v15, 0.0 }
 0x128   :  { %v1613_v13 = vmax.f32 %v1541_v63, %v1577_v3  ;;  %v1435_v14 = vmax.f32 %v869_v7, 0.0  ;;  %v884_v43 = vadd.f32 %v2072_v35, %v2940_v6  ;;  %v1244_v2 = vadd.f32 %v2180_v17, %v2940_v6 }
 0x129   :  { %1651 = vst.msk [vmem:[%s3693_s3 + $0x8] sm:$0xff] %vm1649_vm2, %v1614_v52  ;;  %v1544_v22 = vmax.f32 %v3740_v1, %v1436_v38  ;;  %v3741_v8 = vmax.f32 %v2970_v18, 0.0  ;;  %v1507_v56 = vmax.f32 %v1229_v4, 0.0  ;;  %v878_v62 = vpop.f32.mrf.mxu0  ;;  %v1238_v9 = vpop.f32.mrf.mxu1  ;;  %v3742_v52 = vmax.f32 %v2973_v19, 0.0 }
 0x12a   :  { %1650 = vst.msk [vmem:[%s3693_s3] sm:$0xff] %vm1649_vm2, %v1613_v13  ;;  %v1438_v12 = vmax.f32 %v884_v43, 0.0  ;;  %v1510_v3 = vmax.f32 %v1244_v2, 0.0  ;;  %v879_v7 = vadd.f32 %v2940_v6, %v878_v62  ;;  %v1495_v15 = vmax.f32 %v3277_v59, 0.0  ;;  %v3746_v62 = vld [vmem:[#allocation2_spill] sm:$0xff] }
 0x12b   :  { %v1580_v23 = vmax.f32 %v3741_v8, %v1508_v33  ;;  %v1543_v63 = vmax.f32 %v3742_v52, %v1435_v14  ;;  %v3743_v18 = vmax.f32 %v2977_v21, 0.0  ;;  %v1239_v4 = vadd.f32 %v2940_v6, %v1238_v9  ;;  %v2075_v35 = vpop.f32.mrf.mxu0  ;;  %v2183_v17 = vpop.f32.mrf.mxu1 }
 0x12c   :  { %v3744_v1 = vmax.f32 %v2984_v24, 0.0  ;;  %v3745_v19 = vmax.f32 %v2987_v25, 0.0  ;;  %v1437_v43 = vmax.f32 %v879_v7, 0.0  ;;  %v894_v2 = vadd.f32 %v2075_v35, %v2940_v6 }
 0x12d   :  { %v1616_v38 = vmax.f32 %v1544_v22, %v1580_v23  ;;  %v1579_v33 = vmax.f32 %v3743_v18, %v1507_v56  ;;  %v3309_v8 = vadd.f32 %v3050_v30, %v2940_v6  ;;  %v1509_v22 = vmax.f32 %v1239_v4, 0.0  ;;  %v888_v23 = vpop.f32.mrf.mxu0  ;;  %v1248_v56 = vpop.f32.mrf.mxu1  ;;  %v3748_v30 = vld [vmem:[#allocation5_spill] sm:$0xff] }
 0x12e   :  { %v1546_v13 = vmax.f32 %v3744_v1, %v1438_v12  ;;  %v1582_v14 = vmax.f32 %v3745_v19, %v1510_v3  ;;  %v1254_v24 = vadd.f32 %v2183_v17, %v2940_v6  ;;  %v3747_v9 = vmax.f32 %v3746_v62, 0.0 }
 0x12f   :  { %1653 = vst.msk [vmem:[%s3693_s3 + $0x18] sm:$0xff] %vm1649_vm2, %v1616_v38  ;;  %v1615_v21 = vmax.f32 %v1543_v63, %v1579_v33  ;;  %v1440_v12 = vmax.f32 %v894_v2, 0.0  ;;  %v889_v3 = vadd.f32 %v2940_v6, %v888_v23  ;;  %v3321_v7 = vadd.f32 %v3748_v30, %v2940_v6  ;;  %v3749_v63 = vld [vmem:[#allocation3_spill] sm:$0xff]  ;;  %v2078_v35 = vpop.f32.mrf.mxu0  ;;  %v2186_v17 = vpop.f32.mrf.mxu1 }
 0x130   :  { %v1618_v25 = vmax.f32 %v1546_v13, %v1582_v14  ;;  %v1545_v52 = vmax.f32 %v3747_v9, %v1437_v43  ;;  %v3750_v38 = vmax.f32 %v3749_v63, 0.0  ;;  %v1512_v33 = vmax.f32 %v1254_v24, 0.0 }
 0x131   :  { %1652 = vst.msk [vmem:[%s3693_s3 + $0x10] sm:$0xff] %vm1649_vm2, %v1615_v21  ;;  %v1249_v4 = vadd.f32 %v2940_v6, %v1248_v56  ;;  %v3751_v1 = vmax.f32 %v3007_v36, 0.0  ;;  %v1439_v19 = vmax.f32 %v889_v3, 0.0  ;;  %v904_v14 = vadd.f32 %v2078_v35, %v2940_v6  ;;  %v898_v56 = vpop.f32.mrf.mxu0  ;;  %v1258_v62 = vpop.f32.mrf.mxu1 }
 0x132   :  { %v1581_v18 = vmax.f32 %v3750_v38, %v1509_v22  ;;  %1655 = vst.msk [vmem:[%s3693_s3 + $0x28] sm:$0xff] %vm1649_vm2, %v1618_v25  ;;  %v1264_v43 = vadd.f32 %v2186_v17, %v2940_v6  ;;  %v1426_v2 = vmax.f32 %v3309_v8, 0.0  ;;  %v3752_v22 = vmax.f32 %v3011_v37, 0.0 }
 0x133   :  { %v1548_v13 = vmax.f32 %v3751_v1, %v1440_v12  ;;  %v1511_v23 = vmax.f32 %v1249_v4, 0.0  ;;  %v3753_v9 = vmax.f32 %v3016_v31, 0.0  ;;  %v1442_v30 = vmax.f32 %v904_v14, 0.0  ;;  %v2189_v31 = vpop.f32.mrf.mxu1 }
 0x134   :  { %v1617_v21 = vmax.f32 %v1545_v52, %v1581_v18  ;;  %v1584_v24 = vmax.f32 %v3752_v22, %v1512_v33  ;;  %v1514_v36 = vmax.f32 %v1264_v43, 0.0  ;;  %v899_v12 = vadd.f32 %v2940_v6, %v898_v56  ;;  %v2081_v18 = vpop.f32.mrf.mxu0  ;;  %v3755_v33 = vld [vmem:[#allocation4_spill] sm:$0xff]  ;;  %v3758_v43 = vld [vmem:[#allocation6_spill] sm:$0xff] }
 0x135   :  { %v1547_v25 = vmax.f32 %v3753_v9, %v1439_v19  ;;  %v1498_v3 = vmax.f32 %v3321_v7, 0.0  ;;  %v3754_v37 = vmax.f32 %v3020_v29, 0.0  ;;  %v1259_v38 = vadd.f32 %v2940_v6, %v1258_v62 }
 0x136   :  { %1654 = vst.msk [vmem:[%s3693_s3 + $0x20] sm:$0xff] %vm1649_vm2, %v1617_v21  ;;  %v1620_v52 = vmax.f32 %v1548_v13, %v1584_v24  ;;  %v3756_v4 = vmax.f32 %v3755_v33, 0.0  ;;  %v3757_v17 = vmax.f32 %v3036_v41, 0.0  ;;  %v1441_v19 = vmax.f32 %v899_v12, 0.0  ;;  %v908_v24 = vpop.f32.mrf.mxu0 }
 0x137   :  { %v1583_v63 = vmax.f32 %v3754_v37, %v1511_v23  ;;  %v914_v14 = vadd.f32 %v2081_v18, %v2940_v6  ;;  %v3359_v21 = vadd.f32 %v2940_v6, %v3758_v43  ;;  %v1513_v13 = vmax.f32 %v1259_v38, 0.0  ;;  %v1268_v23 = vpop.f32.mrf.mxu1 }
 0x138   :  { %v1550_v35 = vmax.f32 %v3756_v4, %v1442_v30  ;;  %v1586_v1 = vmax.f32 %v3757_v17, %v1514_v36  ;;  %1657 = vst.msk [vmem:[%s3693_s3 + $0x38] sm:$0xff] %vm1649_vm2, %v1620_v52  ;;  %v1274_v22 = vadd.f32 %v2189_v31, %v2940_v6  ;;  %v3759_v56 = vmax.f32 %v3040_v42, 0.0  ;;  %v3760_v36 = vld [vmem:[#allocation7_spill] sm:$0xff]  ;;  %v2084_v42 = vpop.f32.mrf.mxu0 }
 0x139   :  { %v1619_v29 = vmax.f32 %v1547_v25, %v1583_v63  ;;  %v1444_v9 = vmax.f32 %v914_v14, 0.0  ;;  %v909_v30 = vadd.f32 %v2940_v6, %v908_v24  ;;  %v3371_v12 = vadd.f32 %v2940_v6, %v3760_v36  ;;  %v2192_v38 = vpop.f32.mrf.mxu1 }
 0x13a   :  { %v1622_v41 = vmax.f32 %v1550_v35, %v1586_v1  ;;  %v1549_v62 = vmax.f32 %v3759_v56, %v1441_v19  ;;  %v3761_v25 = vmax.f32 %v3044_v20, 0.0  ;;  %v1516_v37 = vmax.f32 %v1274_v22, 0.0  ;;  %v918_v43 = vpop.f32.mrf.mxu0 }
 0x13b   :  { %1656 = vst.msk [vmem:[%s3693_s3 + $0x30] sm:$0xff] %vm1649_vm2, %v1619_v29  ;;  %v1269_v63 = vadd.f32 %v2940_v6, %v1268_v23  ;;  %v3762_v18 = vmax.f32 %v3048_v39, 0.0  ;;  %v1443_v33 = vmax.f32 %v909_v30, 0.0  ;;  %v924_v4 = vadd.f32 %v2084_v42, %v2940_v6  ;;  %v1278_v29 = vpop.f32.mrf.mxu1 }
 0x13c   :  { %v1585_v52 = vmax.f32 %v3761_v25, %v1513_v13  ;;  %1659 = vst.msk [vmem:[%s3693_s3 + $0x48] sm:$0xff] %vm1649_vm2, %v1622_v41  ;;  %v1284_v35 = vadd.f32 %v2192_v38, %v2940_v6  ;;  %v1425_v20 = vmax.f32 %v3359_v21, 0.0  ;;  %v3763_v1 = vmax.f32 %v3058_v44, 0.0  ;;  %v2087_v30 = vpop.f32.mrf.mxu0 }
 0x13d   :  { %v1552_v31 = vmax.f32 %v3762_v18, %v1444_v9  ;;  %v1515_v14 = vmax.f32 %v1269_v63, 0.0  ;;  %v3764_v13 = vmax.f32 %v3062_v45, 0.0  ;;  %v1446_v24 = vmax.f32 %v924_v4, 0.0  ;;  %v2195_v45 = vpop.f32.mrf.mxu1 }
 0x13e   :  { %v1621_v17 = vmax.f32 %v1549_v62, %v1585_v52  ;;  %v1588_v19 = vmax.f32 %v3763_v1, %v1516_v37  ;;  %v1518_v39 = vmax.f32 %v1284_v35, 0.0  ;;  %v919_v23 = vadd.f32 %v2940_v6, %v918_v43 }
 0x13f   :  { %v1551_v22 = vmax.f32 %v3764_v13, %v1443_v33  ;;  %v1497_v41 = vmax.f32 %v3371_v12, 0.0  ;;  %v3765_v44 = vmax.f32 %v3069_v28, 0.0  ;;  %v1279_v9 = vadd.f32 %v2940_v6, %v1278_v29  ;;  %v1288_v33 = vpop.f32.mrf.mxu1 }
 0x140   :  { %1658 = vst.msk [vmem:[%s3693_s3 + $0x40] sm:$0xff] %vm1649_vm2, %v1621_v17  ;;  %v1624_v56 = vmax.f32 %v1552_v31, %v1588_v19  ;;  %v3766_v36 = vmax.f32 %v3077_v47, 0.0  ;;  %v3767_v52 = vmax.f32 %v3081_v48, 0.0  ;;  %v1445_v63 = vmax.f32 %v919_v23, 0.0  ;;  %v928_v31 = vpop.f32.mrf.mxu0 }
 0x141   :  { %v1587_v62 = vmax.f32 %v3765_v44, %v1515_v14  ;;  %v934_v42 = vadd.f32 %v2087_v30, %v2940_v6  ;;  %v3409_v38 = vadd.f32 %v3095_v40, %v2940_v6  ;;  %v1517_v18 = vmax.f32 %v1279_v9, 0.0  ;;  %v3769_v40 = vld [vmem:[#allocation8_spill] sm:$0xff] }
 0x142   :  { %v1554_v25 = vmax.f32 %v3766_v36, %v1446_v24  ;;  %v1590_v37 = vmax.f32 %v3767_v52, %v1518_v39  ;;  %1661 = vst.msk [vmem:[%s3693_s3 + $0x58] sm:$0xff] %vm1649_vm2, %v1624_v56  ;;  %v1294_v47 = vadd.f32 %v2195_v45, %v2940_v6  ;;  %v3768_v4 = vmax.f32 %v3085_v46, 0.0  ;;  %v2090_v46 = vpop.f32.mrf.mxu0 }
 0x143   :  { %v1623_v28 = vmax.f32 %v1551_v22, %v1587_v62  ;;  %v1448_v17 = vmax.f32 %v934_v42, 0.0  ;;  %v929_v1 = vadd.f32 %v2940_v6, %v928_v31  ;;  %v3421_v19 = vadd.f32 %v3769_v40, %v2940_v6  ;;  %v2198_v22 = vpop.f32.mrf.mxu1 }
 0x144   :  { %v1626_v48 = vmax.f32 %v1554_v25, %v1590_v37  ;;  %v1553_v35 = vmax.f32 %v3768_v4, %v1445_v63  ;;  %v3770_v14 = vmax.f32 %v3089_v49, 0.0  ;;  %v1520_v29 = vmax.f32 %v1294_v47, 0.0  ;;  %v938_v36 = vpop.f32.mrf.mxu0 }
 0x145   :  { %1660 = vst.msk [vmem:[%s3693_s3 + $0x50] sm:$0xff] %vm1649_vm2, %v1623_v28  ;;  %v1289_v13 = vadd.f32 %v2940_v6, %v1288_v33  ;;  %v3771_v24 = vmax.f32 %v3103_v53, 0.0  ;;  %v1447_v23 = vmax.f32 %v929_v1, 0.0  ;;  %v944_v56 = vadd.f32 %v2090_v46, %v2940_v6  ;;  %v1298_v25 = vpop.f32.mrf.mxu1 }
 0x146   :  { %v1589_v43 = vmax.f32 %v3770_v14, %v1517_v18  ;;  %1663 = vst.msk [vmem:[%s3693_s3 + $0x68] sm:$0xff] %vm1649_vm2, %v1626_v48  ;;  %v1304_v44 = vadd.f32 %v2198_v22, %v2940_v6  ;;  %v1428_v49 = vmax.f32 %v3409_v38, 0.0  ;;  %v3772_v9 = vmax.f32 %v3107_v26, 0.0  ;;  %v2093_v33 = vpop.f32.mrf.mxu0  ;;  %v3775_v48 = vld [vmem:[#allocation9_spill] sm:$0xff] }
 0x147   :  { %v1556_v39 = vmax.f32 %v3771_v24, %v1448_v17  ;;  %v1519_v45 = vmax.f32 %v1289_v13, 0.0  ;;  %v3773_v52 = vmax.f32 %v3112_v50, 0.0  ;;  %v1450_v63 = vmax.f32 %v944_v56, 0.0  ;;  %v2201_v50 = vpop.f32.mrf.mxu1 }
 0x148   :  { %v1625_v62 = vmax.f32 %v1553_v35, %v1589_v43  ;;  %v1592_v30 = vmax.f32 %v3772_v9, %v1520_v29  ;;  %v1522_v53 = vmax.f32 %v1304_v44, 0.0  ;;  %v939_v42 = vadd.f32 %v2940_v6, %v938_v36  ;;  %v3778_v43 = vld [vmem:[#allocation10_spill] sm:$0xff]  ;;  %v948_v22 = vpop.f32.mrf.mxu0 }
 0x149   :  { %v1555_v37 = vmax.f32 %v3773_v52, %v1447_v23  ;;  %v1500_v28 = vmax.f32 %v3421_v19, 0.0  ;;  %v3774_v26 = vmax.f32 %v3116_v27, 0.0  ;;  %v1299_v31 = vadd.f32 %v2940_v6, %v1298_v25  ;;  %v1308_v24 = vpop.f32.mrf.mxu1 }
 0x14a   :  { %1662 = vst.msk [vmem:[%s3693_s3 + $0x60] sm:$0xff] %vm1649_vm2, %v1625_v62  ;;  %v1628_v18 = vmax.f32 %v1556_v39, %v1592_v30  ;;  %v3776_v4 = vmax.f32 %v3775_v48, 0.0  ;;  %v3777_v17 = vmax.f32 %v3132_v57, 0.0  ;;  %v1449_v40 = vmax.f32 %v939_v42, 0.0  ;;  %v3780_v62 = vld [vmem:[#allocation11_spill] sm:$0xff] }
 0x14b   :  { %v1591_v47 = vmax.f32 %v3774_v26, %v1519_v45  ;;  %v954_v14 = vadd.f32 %v2093_v33, %v2940_v6  ;;  %v3459_v29 = vadd.f32 %v2940_v6, %v3778_v43  ;;  %v1521_v13 = vmax.f32 %v1299_v31, 0.0  ;;  %v2204_v52 = vpop.f32.mrf.mxu1 }
 0x14c   :  { %v1558_v35 = vmax.f32 %v3776_v4, %v1450_v63  ;;  %v1594_v1 = vmax.f32 %v3777_v17, %v1522_v53  ;;  %1665 = vst.msk [vmem:[%s3693_s3 + $0x78] sm:$0xff] %vm1649_vm2, %v1628_v18  ;;  %v1314_v46 = vadd.f32 %v2201_v50, %v2940_v6  ;;  %v3779_v39 = vmax.f32 %v3136_v58, 0.0  ;;  %v2096_v58 = vpop.f32.mrf.mxu0 }
 0x14d   :  { %v1627_v27 = vmax.f32 %v1555_v37, %v1591_v47  ;;  %v1452_v56 = vmax.f32 %v954_v14, 0.0  ;;  %v949_v44 = vadd.f32 %v2940_v6, %v948_v22  ;;  %v3471_v9 = vadd.f32 %v2940_v6, %v3780_v62  ;;  %v1318_v48 = vpop.f32.mrf.mxu1  ;;  %v3790_v62 = vld [vmem:[#allocation12_spill] sm:$0xff] }
 0x14e   :  { %v1630_v57 = vmax.f32 %v1558_v35, %v1594_v1  ;;  %v1557_v23 = vmax.f32 %v3779_v39, %v1449_v40  ;;  %v3781_v30 = vmax.f32 %v3140_v54, 0.0  ;;  %v1524_v36 = vmax.f32 %v1314_v46, 0.0  ;;  %v958_v50 = vpop.f32.mrf.mxu0  ;;  %v3786_v46 = vld [vmem:[#allocation16_spill] sm:$0xff] }
 0x14f   :  { %1664 = vst.msk [vmem:[%s3693_s3 + $0x70] sm:$0xff] %vm1649_vm2, %v1627_v27  ;;  %v1309_v25 = vadd.f32 %v2940_v6, %v1308_v24  ;;  %v3782_v37 = vmax.f32 %v3144_v55, 0.0  ;;  %v1451_v53 = vmax.f32 %v949_v44, 0.0  ;;  %v964_v42 = vadd.f32 %v2096_v58, %v2940_v6 }
 0x150   :  { %v1593_v45 = vmax.f32 %v3781_v30, %v1521_v13  ;;  %1667 = vst.msk [vmem:[%s3693_s3 + $0x88] sm:$0xff] %vm1649_vm2, %v1630_v57  ;;  %v1324_v18 = vadd.f32 %v2204_v52, %v2940_v6  ;;  %v1427_v54 = vmax.f32 %v3459_v29, 0.0  ;;  %v3783_v47 = vmax.f32 %v3154_v60, 0.0  ;;  %v2099_v13 = vpop.f32.mrf.mxu0  ;;  %v3788_v57 = vld [vmem:[#allocation17_spill] sm:$0xff] }
 0x151   :  { %v1560_v63 = vmax.f32 %v3782_v37, %v1452_v56  ;;  %v1523_v33 = vmax.f32 %v1309_v25, 0.0  ;;  %v3784_v4 = vmax.f32 %v3158_v61, 0.0  ;;  %v1454_v17 = vmax.f32 %v964_v42, 0.0  ;;  %v2207_v61 = vpop.f32.mrf.mxu1  ;;  %v3791_v37 = vld [vmem:[#allocation18_spill] sm:$0xff] }
 0x152   :  { %v1629_v26 = vmax.f32 %v1557_v23, %v1593_v45  ;;  %v1596_v31 = vmax.f32 %v3783_v47, %v1524_v36  ;;  %v1526_v55 = vmax.f32 %v1324_v18, 0.0  ;;  %v959_v1 = vadd.f32 %v2940_v6, %v958_v50  ;;  %v968_v25 = vpop.f32.mrf.mxu0 }
 0x153   :  { %v1559_v35 = vmax.f32 %v3784_v4, %v1451_v53  ;;  %v1499_v40 = vmax.f32 %v3471_v9, 0.0  ;;  %v3785_v60 = vmax.f32 %v3165_v51, 0.0  ;;  %v1319_v27 = vadd.f32 %v2940_v6, %v1318_v48  ;;  %v1328_v58 = vpop.f32.mrf.mxu1 }
 0x154   :  { %1666 = vst.msk [vmem:[%s3693_s3 + $0x80] sm:$0xff] %vm1649_vm2, %v1629_v26  ;;  %v1632_v14 = vmax.f32 %v1560_v63, %v1596_v31  ;;  %v3787_v22 = vmax.f32 %v3786_v46, 0.0  ;;  %v3789_v39 = vmax.f32 %v3788_v57, 0.0  ;;  %v1453_v56 = vmax.f32 %v959_v1, 0.0  ;;  %v3793_v26 = vld [vmem:[#allocation13_spill] sm:$0xff]  ;;  %v3794_v31 = vld [vmem:[#allocation19_spill] sm:$0xff] }
 0x155   :  { %v1595_v43 = vmax.f32 %v3785_v60, %v1523_v33  ;;  %v974_v44 = vadd.f32 %v2099_v13, %v2940_v6  ;;  %v3509_v30 = vadd.f32 %v3790_v62, %v2940_v6  ;;  %v1525_v45 = vmax.f32 %v1319_v27, 0.0 }
 0x156   :  { %v1562_v24 = vmax.f32 %v3787_v22, %v1454_v17  ;;  %v1598_v23 = vmax.f32 %v3789_v39, %v1526_v55  ;;  %1669 = vst.msk [vmem:[%s3693_s3 + $0x98] sm:$0xff] %vm1649_vm2, %v1632_v14  ;;  %v1334_v36 = vadd.f32 %v2207_v61, %v2940_v6  ;;  %v3792_v63 = vmax.f32 %v3791_v37, 0.0  ;;  %v2210_v17 = vpop.f32.mrf.mxu1  ;;  %v3797_v61 = vld [vmem:[#allocation22_spill] sm:$0xff] }
 0x157   :  { %v1631_v51 = vmax.f32 %v1559_v35, %v1595_v43  ;;  %v1456_v42 = vmax.f32 %v974_v44, 0.0  ;;  %v969_v18 = vadd.f32 %v2940_v6, %v968_v25  ;;  %v3521_v47 = vadd.f32 %v3793_v26, %v2940_v6  ;;  %v2102_v35 = vpop.f32.mrf.mxu0  ;;  %v3801_v25 = vld [vmem:[#allocation24_spill] sm:$0xff] }
 0x158   :  { %v1634_v52 = vmax.f32 %v1562_v24, %v1598_v23  ;;  %v1561_v53 = vmax.f32 %v3792_v63, %v1453_v56  ;;  %v3795_v33 = vmax.f32 %v3794_v31, 0.0  ;;  %v1528_v48 = vmax.f32 %v1334_v36, 0.0  ;;  %v1338_v39 = vpop.f32.mrf.mxu1  ;;  %v3799_v23 = vld [vmem:[#allocation23_spill] sm:$0xff] }
 0x159   :  { %1668 = vst.msk [vmem:[%s3693_s3 + $0x90] sm:$0xff] %vm1649_vm2, %v1631_v51  ;;  %v1329_v4 = vadd.f32 %v2940_v6, %v1328_v58  ;;  %v3796_v55 = vmax.f32 %v3199_v5, 0.0  ;;  %v1455_v14 = vmax.f32 %v969_v18, 0.0  ;;  %v984_v60 = vadd.f32 %v2102_v35, %v2940_v6  ;;  %v978_v57 = vpop.f32.mrf.mxu0 }
 0x15a   :  { %v1597_v50 = vmax.f32 %v3795_v33, %v1525_v45  ;;  %1671 = vst.msk [vmem:[%s3693_s3 + $0xa8] sm:$0xff] %vm1649_vm2, %v1634_v52  ;;  %v1344_v43 = vadd.f32 %v2210_v17, %v2940_v6  ;;  %v1430_v27 = vmax.f32 %v3509_v30, 0.0  ;;  %v3798_v46 = vmax.f32 %v3797_v61, 0.0 }
 0x15b   :  { %v1564_v1 = vmax.f32 %v3796_v55, %v1456_v42  ;;  %v1527_v24 = vmax.f32 %v1329_v4, 0.0  ;;  %v3800_v56 = vmax.f32 %v3799_v23, 0.0  ;;  %v1458_v62 = vmax.f32 %v984_v60, 0.0  ;;  %v2105_v63 = vpop.f32.mrf.mxu0  ;;  %v3803_v42 = vld [vmem:[#allocation25_spill] sm:$0xff]  ;;  %v3806_v4 = vld [vmem:[#allocation14_spill] sm:$0xff] }
 0x15c   :  { %v1633_v13 = vmax.f32 %v1561_v53, %v1597_v50  ;;  %v1600_v22 = vmax.f32 %v3798_v46, %v1528_v48  ;;  %v1530_v5 = vmax.f32 %v1344_v43, 0.0  ;;  %v979_v51 = vadd.f32 %v2940_v6, %v978_v57  ;;  %v2213_v53 = vpop.f32.mrf.mxu1  ;;  %v3809_v57 = vld [vmem:[#allocation28_spill] sm:$0xff] }
 0x15d   :  { %v1563_v44 = vmax.f32 %v3800_v56, %v1455_v14  ;;  %v1502_v45 = vmax.f32 %v3521_v47, 0.0  ;;  %v3802_v58 = vmax.f32 %v3801_v25, 0.0  ;;  %v1339_v37 = vadd.f32 %v2940_v6, %v1338_v39  ;;  %v988_v14 = vpop.f32.mrf.mxu0 }
 0x15e   :  { %1670 = vst.msk [vmem:[%s3693_s3 + $0xa0] sm:$0xff] %vm1649_vm2, %v1633_v13  ;;  %v1636_v36 = vmax.f32 %v1564_v1, %v1600_v22  ;;  %v3804_v18 = vmax.f32 %v3803_v42, 0.0  ;;  %v3805_v31 = vmax.f32 %v3228_v11, 0.0  ;;  %v1457_v50 = vmax.f32 %v979_v51, 0.0  ;;  %v1348_v60 = vpop.f32.mrf.mxu1  ;;  %v3808_v22 = vld [vmem:[#allocation15_spill] sm:$0xff] }
 0x15f   :  { %v1599_v52 = vmax.f32 %v3802_v58, %v1527_v24  ;;  %v994_v48 = vadd.f32 %v2105_v63, %v2940_v6  ;;  %v3559_v35 = vadd.f32 %v2940_v6, %v3806_v4  ;;  %v1529_v55 = vmax.f32 %v1339_v37, 0.0 }
 0x160   :  { %v1566_v26 = vmax.f32 %v3804_v18, %v1458_v62  ;;  %v1602_v33 = vmax.f32 %v3805_v31, %v1530_v5  ;;  %1673 = vst.msk [vmem:[%s3693_s3 + $0xb8] sm:$0xff] %vm1649_vm2, %v1636_v36  ;;  %v1354_v1 = vadd.f32 %v2213_v53, %v2940_v6  ;;  %v3807_v43 = vmax.f32 %v3232_v16, 0.0  ;;  %v2108_v16 = vpop.f32.mrf.mxu0  ;;  %v2216_v62 = vpop.f32.mrf.mxu1  ;;  %v3811_v5 = vld [vmem:[#allocation29_spill] sm:$0xff] }
 0x161   :  { %v1635_v17 = vmax.f32 %v1563_v44, %v1599_v52  ;;  %v1460_v61 = vmax.f32 %v994_v48, 0.0  ;;  %v989_v46 = vadd.f32 %v2940_v6, %v988_v14  ;;  %v3571_v24 = vadd.f32 %v2940_v6, %v3808_v22  ;;  %v3814_v22 = vld [vmem:[#allocation21_spill] sm:$0xff] }
 0x162   :  { %v1638_v11 = vmax.f32 %v1566_v26, %v1602_v33  ;;  %v1565_v13 = vmax.f32 %v3807_v43, %v1457_v50  ;;  %v3810_v39 = vmax.f32 %v3809_v57, 0.0  ;;  %v1532_v56 = vmax.f32 %v1354_v1, 0.0  ;;  %v998_v18 = vpop.f32.mrf.mxu0  ;;  %v1358_v26 = vpop.f32.mrf.mxu1 }
 0x163   :  { %1672 = vst.msk [vmem:[%s3693_s3 + $0xb0] sm:$0xff] %vm1649_vm2, %v1635_v17  ;;  %v1349_v44 = vadd.f32 %v2940_v6, %v1348_v60  ;;  %v3812_v51 = vmax.f32 %v3811_v5, 0.0  ;;  %v1459_v25 = vmax.f32 %v989_v46, 0.0  ;;  %v1004_v58 = vadd.f32 %v2108_v16, %v2940_v6 }
 0x164   :  { %v1601_v23 = vmax.f32 %v3810_v39, %v1529_v55  ;;  %1675 = vst.msk [vmem:[%s3693_s3 + $0xc8] sm:$0xff] %vm1649_vm2, %v1638_v11  ;;  %v1364_v52 = vadd.f32 %v2216_v62, %v2940_v6  ;;  %v1429_v37 = vmax.f32 %v3559_v35, 0.0  ;;  %v1604_v53 = vmax.f32 %v1496_v0, %v1532_v56  ;;  %v2111_v55 = vpop.f32.mrf.mxu0  ;;  %v2219_v10 = vpop.f32.mrf.mxu1  ;;  %v3813_v11 = vld [vmem:[#allocation20_spill] sm:$0xff] }
 0x165   :  { %v1568_v36 = vmax.f32 %v3812_v51, %v1460_v61  ;;  %v1531_v42 = vmax.f32 %v1349_v44, 0.0  ;;  %v1567_v31 = vmax.f32 %v1423_v34, %v1459_v25  ;;  %v1462_v33 = vmax.f32 %v1004_v58, 0.0 }
 0x166   :  { %v1637_v63 = vmax.f32 %v1565_v13, %v1601_v23  ;;  %v1534_v50 = vmax.f32 %v1364_v52, 0.0  ;;  %v999_v48 = vadd.f32 %v2940_v6, %v998_v18  ;;  %v1501_v4 = vmax.f32 %v3571_v24, 0.0  ;;  %v1368_v13 = vpop.f32.mrf.mxu1 }
 0x167   :  { %v1640_v17 = vmax.f32 %v1568_v36, %v1604_v53  ;;  %v1603_v32 = vmax.f32 %v1495_v15, %v1531_v42  ;;  %v1359_v0 = vadd.f32 %v2940_v6, %v1358_v26  ;;  %v1570_v34 = vmax.f32 %v1426_v2, %v1462_v33  ;;  %v1008_v2 = vpop.f32.mrf.mxu0  ;;  %v3815_v53 = vld [vmem:[#allocation26_spill] sm:$0xff] }
 0x168   :  { %1674 = vst.msk [vmem:[%s3693_s3 + $0xc0] sm:$0xff] %vm1649_vm2, %v1637_v63  ;;  %v1606_v1 = vmax.f32 %v1498_v3, %v1534_v50  ;;  %v1461_v14 = vmax.f32 %v999_v48, 0.0  ;;  %v1014_v60 = vadd.f32 %v2111_v55, %v2940_v6  ;;  %v3609_v43 = vadd.f32 %v3813_v11, %v2940_v6  ;;  %v2222_v21 = vpop.f32.mrf.mxu1  ;;  %v3816_v48 = vld [vmem:[#allocation27_spill] sm:$0xff]  ;;  %v2246_v55 = vld [vmem:[%s3692_s2] ss:$0 sm:$0xff] }
 0x169   :  { %1677 = vst.msk [vmem:[%s3693_s3 + $0xd8] sm:$0xff] %vm1649_vm2, %v1640_v17  ;;  %v1639_v59 = vmax.f32 %v1567_v31, %v1603_v32  ;;  %v1533_v15 = vmax.f32 %v1359_v0, 0.0  ;;  %v1374_v8 = vadd.f32 %v2219_v10, %v2940_v6  ;;  %v1009_v46 = vadd.f32 %v2940_v6, %v1008_v2  ;;  %v2114_v44 = vpop.f32.mrf.mxu0 }
 0x16a   :  { %v1642_v7 = vmax.f32 %v1570_v34, %v1606_v1  ;;  %v1569_v3 = vmax.f32 %v1425_v20, %v1461_v14  ;;  %v1464_v61 = vmax.f32 %v1014_v60, 0.0  ;;  %v1214_v57 = vadd.f32 %v3814_v22, %v2940_v6  ;;  %v1378_v58 = vpop.f32.mrf.mxu1 }
 0x16b   :  { %1676 = vst.msk [vmem:[%s3693_s3 + $0xd0] sm:$0xff] %vm1649_vm2, %v1639_v59  ;;  %v1605_v39 = vmax.f32 %v1497_v41, %v1533_v15  ;;  %v1536_v23 = vmax.f32 %v1374_v8, 0.0  ;;  %v1369_v56 = vadd.f32 %v2940_v6, %v1368_v13  ;;  %v1463_v16 = vmax.f32 %v1009_v46, 0.0  ;;  %v1018_v25 = vpop.f32.mrf.mxu0 }
 0x16c   :  { %1679 = vst.msk [vmem:[%s3693_s3 + $0xe8] sm:$0xff] %vm1649_vm2, %v1642_v7  ;;  %v1572_v20 = vmax.f32 %v1428_v49, %v1464_v61  ;;  %v1024_v62 = vadd.f32 %v2114_v44, %v2940_v6  ;;  %v1384_v5 = vadd.f32 %v2222_v21, %v2940_v6  ;;  %v1432_v12 = vmax.f32 %v3609_v43, 0.0 }
 0x16d   :  { %v1641_v41 = vmax.f32 %v1569_v3, %v1605_v39  ;;  %v1608_v51 = vmax.f32 %v1500_v28, %v1536_v23  ;;  %v1535_v36 = vmax.f32 %v1369_v56, 0.0  ;;  %v1571_v52 = vmax.f32 %v1427_v54, %v1463_v16  ;;  %v2117_v29 = vpop.f32.mrf.mxu0  ;;  %v2225_v54 = vpop.f32.mrf.mxu1 }
 0x16e   :  { %v1466_v63 = vmax.f32 %v1024_v62, 0.0  ;;  %v1538_v38 = vmax.f32 %v1384_v5, 0.0  ;;  %v1019_v49 = vadd.f32 %v2940_v6, %v1018_v25  ;;  %v849_v42 = vadd.f32 %v2940_v6, %v3815_v53 }
 0x16f   :  { %1678 = vst.msk [vmem:[%s3693_s3 + $0xe0] sm:$0xff] %vm1649_vm2, %v1641_v41  ;;  %v1644_v19 = vmax.f32 %v1572_v20, %v1608_v51  ;;  %v1607_v28 = vmax.f32 %v1499_v40, %v1535_v36  ;;  %v1379_v18 = vadd.f32 %v2940_v6, %v1378_v58  ;;  %v1034_v50 = vadd.f32 %v2117_v29, %v2940_v6  ;;  %v1028_v30 = vpop.f32.mrf.mxu0 }
 0x170   :  { %v1574_v26 = vmax.f32 %v1430_v27, %v1466_v63  ;;  %v1610_v31 = vmax.f32 %v1502_v45, %v1538_v38  ;;  %v1465_v33 = vmax.f32 %v1019_v49, 0.0  ;;  %v1209_v17 = vadd.f32 %v2940_v6, %v3816_v48  ;;  %v1388_v27 = vpop.f32.mrf.mxu1 }
 0x171   :  { %1681 = vst.msk [vmem:[%s3693_s3 + $0xf8] sm:$0xff] %vm1649_vm2, %v1644_v19  ;;  %v1643_v9 = vmax.f32 %v1571_v52, %v1607_v28  ;;  %v1537_v40 = vmax.f32 %v1379_v18, 0.0  ;;  %v1394_v32 = vadd.f32 %v2225_v54, %v2940_v6  ;;  %v1468_v45 = vmax.f32 %v1034_v50, 0.0 }
 0x172   :  { %v1646_v0 = vmax.f32 %v1574_v26, %v1610_v31  ;;  %v1573_v47 = vmax.f32 %v1429_v37, %v1465_v33  ;;  %v1029_v10 = vadd.f32 %v2246_v55, %v1028_v30  ;;  %v1504_v34 = vmax.f32 %v1214_v57, 0.0 }
 0x173   :  { %1680 = vst.msk [vmem:[%s3693_s3 + $0xf0] sm:$0xff] %vm1649_vm2, %v1643_v9  ;;  %v1609_v6 = vmax.f32 %v1501_v4, %v1537_v40  ;;  %v1540_v1 = vmax.f32 %v1394_v32, 0.0  ;;  %v1389_v14 = vadd.f32 %v2246_v55, %v1388_v27  ;;  %v1431_v60 = vmax.f32 %v849_v42, 0.0 }
 0x174   :  { %1683 = vst.msk [vmem:[%s3693_s3 + $0x108] sm:$0xff] %vm1649_vm2, %v1646_v0  ;;  %v1576_v35 = vmax.f32 %v1432_v12, %v1468_v45  ;;  %v1467_v37 = vmax.f32 %v1029_v10, 0.0  ;;  %v1503_v11 = vmax.f32 %v1209_v17, 0.0 }
 0x175   :  { %v1645_v43 = vmax.f32 %v1573_v47, %v1609_v6  ;;  %v1612_v59 = vmax.f32 %v1504_v34, %v1540_v1  ;;  %v1539_v15 = vmax.f32 %v1389_v14, 0.0 }
 0x176   :  { %v1575_v8 = vmax.f32 %v1431_v60, %v1467_v37 }
 0x177   :  { %1682 = vst.msk [vmem:[%s3693_s3 + $0x100] sm:$0xff] %vm1649_vm2, %v1645_v43  ;;  %v1648_v24 = vmax.f32 %v1576_v35, %v1612_v59  ;;  %v1611_v4 = vmax.f32 %v1503_v11, %v1539_v15 }
 0x179   :  { %1685 = vst.msk [vmem:[%s3693_s3 + $0x118] sm:$0xff] %vm1649_vm2, %v1648_v24  ;;  %v1647_v2 = vmax.f32 %v1575_v8, %v1611_v4 }
 0x17b   :  { %1684 = vst.msk [vmem:[%s3693_s3 + $0x110] sm:$0xff] %vm1649_vm2, %v1647_v2 }

// kernel: lenet_forward.3
= control target key start
LH: loop header
LB: loop body
LE: loop exit
PB: predicated region body
PF: predicated region fallthrough
CT: control target
= control target key end

     0   :  { %v2127_v1 = vmov 0.0   ;;  %vm91_vm0 = vcmask 179200   ;;  %s2671_s0 = inlined_call_operand.vmem [shape: f32[128,150], index: 0, kind: input, shape index: {}]   ;;  %s2672_s1 = inlined_call_operand.vmem [shape: f32[150,16], index: 1, kind: input, shape index: {}]   ;;  %s2673_s2 = inlined_call_operand.vmem [shape: f32[1,16], index: 2, kind: input, shape index: {}]   ;;  %s2674_s3 = inlined_call_operand.vmem [shape: f32[16,16,120], index: 3, kind: input, shape index: {}]   ;;  %s2675_s4 = inlined_call_operand.vmem [shape: f32[1,120], index: 4, kind: input, shape index: {}]   ;;  %s2676_s5 = inlined_call_operand.vmem [shape: f32[120,84], index: 5, kind: input, shape index: {}]   ;;  %s2677_s6 = inlined_call_operand.vmem [shape: f32[1,84], index: 6, kind: input, shape index: {}]   ;;  %s2678_s7 = inlined_call_operand.vmem [shape: f32[84,10], index: 7, kind: input, shape index: {}]   ;;  %s2679_s8 = inlined_call_operand.vmem [shape: f32[1,10], index: 8, kind: input, shape index: {}]   ;;  %s2680_s9 = inlined_call_operand.hbm [shape: f32[2,10], index: 9, kind: output, shape index: {}]  }
   0x1   :  { %v80_v0 = vld [vmem:[%s2672_s1 + $0x78] sm:$0xff]  ;;  %144 = vmatprep.subr.mxu0 %v2127_v1  ;;  %v79_v2 = vld [vmem:[%s2672_s1 + $0x70] sm:$0xff]  ;;  %1932 = vmatprep.subr.mxu1 %v2127_v1  ;;  %v78_v3 = vld [vmem:[%s2672_s1 + $0x68] sm:$0xff] }
   0x2   :  { %145 = vmatpush1.msra.mxu0 %v80_v0  ;;  %v77_v4 = vld [vmem:[%s2672_s1 + $0x60] sm:$0xff]  ;;  %v34_v5 = vld [vmem:[%s2671_s0 + $0x8] sm:$0xff]  ;;  %v76_v6 = vld [vmem:[%s2672_s1 + $0x58] sm:$0xff] }
   0x3   :  { %146 = vmatprep.subr.mxu0 %v2127_v1  ;;  %1788 = vmatprep.mubr.msk.f32.mxu0 %vm91_vm0, %v34_v5  ;;  %v75_v7 = vld [vmem:[%s2672_s1 + $0x50] sm:$0xff]  ;;  %v74_v8 = vld [vmem:[%s2672_s1 + $0x48] sm:$0xff]  ;;  %v73_v9 = vld [vmem:[%s2672_s1 + $0x40] sm:$0xff] }
   0x4   :  { %147 = vmatpush1.msra.mxu0 %v79_v2  ;;  %v72_v10 = vld [vmem:[%s2672_s1 + $0x38] sm:$0xff]  ;;  %v71_v11 = vld [vmem:[%s2672_s1 + $0x30] sm:$0xff] }
   0x5   :  { %148 = vmatprep.subr.mxu0 %v2127_v1 }
   0x6   :  { %149 = vmatpush1.msra.mxu0 %v78_v3 }
   0x7   :  { %150 = vmatprep.subr.mxu0 %v2127_v1 }
   0x8   :  { %151 = vmatpush1.msra.mxu0 %v77_v4 }
   0x9   :  { %152 = vmatprep.subr.mxu0 %v2127_v1 }
   0xa   :  { %153 = vmatpush1.msra.mxu0 %v76_v6 }
   0xb   :  { %154 = vmatprep.subr.mxu0 %v2127_v1 }
   0xc   :  { %155 = vmatpush1.msra.mxu0 %v75_v7 }
   0xd   :  { %156 = vmatprep.subr.mxu0 %v2127_v1 }
   0xe   :  { %157 = vmatpush1.msra.mxu0 %v74_v8 }
   0xf   :  { %158 = vmatprep.subr.mxu0 %v2127_v1 }
  0x10   :  { %159 = vmatpush1.msra.mxu0 %v73_v9 }
  0x11   :  { %160 = vmatprep.subr.mxu0 %v2127_v1 }
  0x12   :  { %14 = vsyncpa [#allocation4], 0  ;;  %161 = vmatpush1.msra.mxu0 %v72_v10  ;;  %v70_v12 = vld [vmem:[%s2672_s1 + $0x28] sm:$0xff]  ;;  %v69_v13 = vld [vmem:[%s2672_s1 + $0x20] sm:$0xff]  ;;  %vm140_vm1 = vcmask 1045504   ;;  %vm2128_vm2 = vmmov 0  }
  0x13   :  { %162 = vmatprep.subr.mxu0 %v2127_v1  ;;  %v68_v14 = vld [vmem:[%s2672_s1 + $0x18] sm:$0xff]  ;;  %v67_v15 = vld [vmem:[%s2672_s1 + $0x10] sm:$0xff]  ;;  %v66_v16 = vld [vmem:[%s2672_s1 + $0x8] sm:$0xff]  ;;  %1936 = vmatprep.mubr.msk.f32.mxu1 %vm2128_vm2, %v2127_v1  ;;  %vm317_vm3 = vcmask 130048   ;;  %vm1695_vm4 = vcmask 1043456   ;;  %vm1598_vm5 = vcmask 982016  }
  0x14   :  { %163 = vmatpush1.msra.mxu0 %v71_v11  ;;  %v65_v17 = vld [vmem:[%s2672_s1] sm:$0xff]  ;;  %v83_v18 = vld [vmem:[%s2672_s1 + $0x90] sm:$0x3f]  ;;  %v82_v19 = vld [vmem:[%s2672_s1 + $0x88] sm:$0xff]  ;;  %vm1691_vm6 = vcmask 687104   ;;  %s2129_s23 = smov [#allocation3]  }
  0x15   :  { %164 = vmatprep.subr.mxu0 %v2127_v1  ;;  %v81_v20 = vld [vmem:[%s2672_s1 + $0x80] sm:$0xff]  ;;  %v36_v22 = vld [vmem:[%s2671_s0 + $0x18] sm:$0xff]  ;;  %v35_v23 = vld [vmem:[%s2671_s0 + $0x10] sm:$0xff]  ;;  %s1778_s24 = sshll.u32 %s2129_s23, 4  ;;  %vm1770_vm7 = vcmask 74752   ;;  %s1779_s24 = int_to_ptr.vmem [resolvable:$true] %s1778_s24 }
  0x16   :  { %165 = vmatpush1.msra.mxu0 %v70_v12  ;;  %v33_v21 = vld [vmem:[%s2671_s0] sm:$0xff]  ;;  %v38_v24 = vld [vmem:[%s2671_s0 + $0x28] sm:$0xff]  ;;  %v40_v26 = vld [vmem:[%s2671_s0 + $0x38] sm:$0xff]  ;;  %p2110_p1 = scmp.lt.s32.totalorder %s1779_s24, %s1779_s24 }
  0x17   :  { %166 = vmatprep.subr.mxu0 %v2127_v1  ;;  %v37_v25 = vld [vmem:[%s2671_s0 + $0x20] sm:$0xff]  ;;  %v39_v27 = vld [vmem:[%s2671_s0 + $0x30] sm:$0xff]  ;;  %v42_v28 = vld [vmem:[%s2671_s0 + $0x48] sm:$0xff] }
  0x18   :  { %167 = vmatpush1.msra.mxu0 %v69_v13  ;;  %v41_v29 = vld [vmem:[%s2671_s0 + $0x40] sm:$0xff]  ;;  %v44_v30 = vld [vmem:[%s2671_s0 + $0x58] sm:$0xff]  ;;  %v43_v31 = vld [vmem:[%s2671_s0 + $0x50] sm:$0xff] }
  0x19   :  { %168 = vmatprep.subr.mxu0 %v2127_v1  ;;  %v46_v32 = vld [vmem:[%s2671_s0 + $0x68] sm:$0xff]  ;;  %v45_v33 = vld [vmem:[%s2671_s0 + $0x60] sm:$0xff]  ;;  %v48_v34 = vld [vmem:[%s2671_s0 + $0x78] sm:$0xff] }
  0x1a   :  { %169 = vmatpush1.msra.mxu0 %v68_v14  ;;  %v47_v35 = vld [vmem:[%s2671_s0 + $0x70] sm:$0xff]  ;;  %v50_v36 = vld [vmem:[%s2671_s0 + $0x88] sm:$0xff]  ;;  %v49_v37 = vld [vmem:[%s2671_s0 + $0x80] sm:$0xff] }
  0x1b   :  { %170 = vmatprep.subr.mxu0 %v2127_v1  ;;  %v52_v38 = vld [vmem:[%s2671_s0 + $0x98] sm:$0xff]  ;;  %v51_v39 = vld [vmem:[%s2671_s0 + $0x90] sm:$0xff]  ;;  %v54_v40 = vld [vmem:[%s2671_s0 + $0xa8] sm:$0xff] }
  0x1c   :  { %171 = vmatpush1.msra.mxu0 %v67_v15  ;;  %v53_v41 = vld [vmem:[%s2671_s0 + $0xa0] sm:$0xff]  ;;  %v56_v42 = vld [vmem:[%s2671_s0 + $0xb8] sm:$0xff]  ;;  %v55_v43 = vld [vmem:[%s2671_s0 + $0xb0] sm:$0xff] }
  0x1d   :  { %172 = vmatprep.subr.mxu0 %v2127_v1  ;;  %v58_v44 = vld [vmem:[%s2671_s0 + $0xc8] sm:$0xff]  ;;  %v57_v45 = vld [vmem:[%s2671_s0 + $0xc0] sm:$0xff]  ;;  %v60_v46 = vld [vmem:[%s2671_s0 + $0xd8] sm:$0xff] }
  0x1e   :  { %173 = vmatpush1.msra.mxu0 %v66_v16  ;;  %v59_v47 = vld [vmem:[%s2671_s0 + $0xd0] sm:$0xff]  ;;  %v62_v48 = vld [vmem:[%s2671_s0 + $0xe8] sm:$0xff]  ;;  %v61_v49 = vld [vmem:[%s2671_s0 + $0xe0] sm:$0xff] }
  0x1f   :  { %174 = vmatprep.subr.mxu0 %v2127_v1  ;;  %v64_v50 = vld [vmem:[%s2671_s0 + $0xf8] sm:$0xff]  ;;  %v63_v51 = vld [vmem:[%s2671_s0 + $0xf0] sm:$0xff]  ;;  %v1786_v13 = vld [vmem:[%s2673_s2] ss:$0 sm:$0xff] }
  0x20   :  { %175 = vmatpush1.msra.mxu0 %v65_v17  ;;  %v1805_v52 = vld [vmem:[%s2674_s3 + $0x18] sm:$0xff]  ;;  %v1804_v53 = vld [vmem:[%s2674_s3 + $0x10] sm:$0xff] }
  0x21   :  { %202 = vmatprep.subr.mxu0 %v2127_v1  ;;  %1933 = vmatpush3.msra.mxu1 %v1805_v52 }
  0x22   :  { %1787 = vmatpush2.msk.msra.mxu0 %vm140_vm1, %v83_v18  ;;  %1934 = vmatprep.subr.mxu1 %v2127_v1 }
  0x23   :  { %204 = vmatprep.subr.mxu0 %v2127_v1  ;;  %1935 = vmatpush3.msra.mxu1 %v1804_v53 }
  0x24   :  { %205 = vmatpush2.msra.mxu0 %v82_v19  ;;  %1939 = vmatprep.subr.mxu1 %v2127_v1 }
  0x25   :  { %206 = vmatprep.subr.mxu0 %v2127_v1 }
  0x26   :  { %207 = vmatpush2.msra.mxu0 %v81_v20 }
  0x27   :  { %209 = vmatmul.mubr.f32.vlgmr.msra.gmra.mxu0 %v33_v21  ;;  %2077 = vmatprep.subr.mxu0 %v2127_v1 }
  0x28   :  { %1789 = vmatprep.mubr.msk.f32.mxu0 %vm91_vm0, %v36_v22 }
  0x2b   :  { %214 = vmatmul.mubr.f32.gmra.mxu0 %v35_v23 }
  0x2c   :  { %1790 = vmatprep.mubr.msk.f32.mxu0 %vm91_vm0, %v38_v24 }
  0x2f   :  { %219 = vmatmul.mubr.f32.gmra.mxu0 %v37_v25 }
  0x30   :  { %1791 = vmatprep.mubr.msk.f32.mxu0 %vm91_vm0, %v40_v26 }
  0x33   :  { %224 = vmatmul.mubr.f32.gmra.mxu0 %v39_v27 }
  0x34   :  { %1792 = vmatprep.mubr.msk.f32.mxu0 %vm91_vm0, %v42_v28 }
  0x37   :  { %229 = vmatmul.mubr.f32.gmra.mxu0 %v41_v29 }
  0x38   :  { %1793 = vmatprep.mubr.msk.f32.mxu0 %vm91_vm0, %v44_v30 }
  0x3b   :  { %234 = vmatmul.mubr.f32.gmra.mxu0 %v43_v31 }
  0x3c   :  { %1794 = vmatprep.mubr.msk.f32.mxu0 %vm91_vm0, %v46_v32 }
  0x3f   :  { %239 = vmatmul.mubr.f32.gmra.mxu0 %v45_v33 }
  0x40   :  { %1795 = vmatprep.mubr.msk.f32.mxu0 %vm91_vm0, %v48_v34 }
  0x43   :  { %244 = vmatmul.mubr.f32.gmra.mxu0 %v47_v35 }
  0x44   :  { %1796 = vmatprep.mubr.msk.f32.mxu0 %vm91_vm0, %v50_v36 }
  0x47   :  { %249 = vmatmul.mubr.f32.gmra.mxu0 %v49_v37 }
  0x48   :  { %1797 = vmatprep.mubr.msk.f32.mxu0 %vm91_vm0, %v52_v38 }
  0x4b   :  { %254 = vmatmul.mubr.f32.gmra.mxu0 %v51_v39 }
  0x4c   :  { %1798 = vmatprep.mubr.msk.f32.mxu0 %vm91_vm0, %v54_v40 }
  0x4f   :  { %259 = vmatmul.mubr.f32.gmra.mxu0 %v53_v41 }
  0x50   :  { %1799 = vmatprep.mubr.msk.f32.mxu0 %vm91_vm0, %v56_v42 }
  0x53   :  { %264 = vmatmul.mubr.f32.gmra.mxu0 %v55_v43 }
  0x54   :  { %1800 = vmatprep.mubr.msk.f32.mxu0 %vm91_vm0, %v58_v44 }
  0x57   :  { %269 = vmatmul.mubr.f32.gmra.mxu0 %v57_v45 }
  0x58   :  { %1801 = vmatprep.mubr.msk.f32.mxu0 %vm91_vm0, %v60_v46 }
  0x5b   :  { %274 = vmatmul.mubr.f32.gmra.mxu0 %v59_v47 }
  0x5c   :  { %1802 = vmatprep.mubr.msk.f32.mxu0 %vm91_vm0, %v62_v48 }
  0x5f   :  { %279 = vmatmul.mubr.f32.gmra.mxu0 %v61_v49 }
  0x60   :  { %1803 = vmatprep.mubr.msk.f32.mxu0 %vm91_vm0, %v64_v50 }
  0x63   :  { %284 = vmatmul.mubr.f32.gmra.mxu0 %v63_v51 }
  0x64   :  { %2099 = vmatprep.mubr.msk.f32.mxu0 %vm2128_vm2, %v2127_v1 }
  0xe7   :  { %v210_v54 = vpop.f32.mrf.mxu0 }
  0xe8   :  { %v211_v17 = vadd.f32 %v1786_v13, %v210_v54 }
  0xe9   :  { %v212_v55 = vpop.f32.mrf.mxu0 }
  0xea   :  { %v289_v25 = vmax.f32 %v211_v17, 0.0  ;;  %v1818_v17 = vld [vmem:[%s2674_s3 + $0x58] sm:$0xff] }
  0xeb   :  { %v215_v56 = vpop.f32.mrf.mxu0 }
  0xec   :  { %v216_v23 = vadd.f32 %v1786_v13, %v215_v56 }
  0xed   :  { %v217_v57 = vpop.f32.mrf.mxu0 }
  0xee   :  { %v290_v35 = vmax.f32 %v216_v23, 0.0  ;;  %v1824_v23 = vld [vmem:[%s2674_s3 + $0x78] sm:$0xff] }
  0xef   :  { %v220_v58 = vpop.f32.mrf.mxu0 }
  0xf0   :  { %v221_v36 = vadd.f32 %v1786_v13, %v220_v58 }
  0xf1   :  { %v222_v59 = vpop.f32.mrf.mxu0 }
  0xf2   :  { %v291_v48 = vmax.f32 %v221_v36, 0.0 }
  0xf3   :  { %v225_v60 = vpop.f32.mrf.mxu0 }
  0xf4   :  { %v226_v49 = vadd.f32 %v1786_v13, %v225_v60  ;;  %v324_v60 = vld [vmem:[%s2674_s3 + $0x8] sm:$0xff] }
  0xf5   :  { %v227_v61 = vpop.f32.mrf.mxu0 }
  0xf7   :  { %v230_v62 = vpop.f32.mrf.mxu0 }
  0xf8   :  { %v231_v15 = vadd.f32 %v1786_v13, %v230_v62  ;;  %v292_v62 = vmax.f32 %v226_v49, 0.0  ;;  %v1847_v49 = vld [vmem:[%s2674_s3 + $0xf0] sm:$0xff] }
  0xf9   :  { %v232_v63 = vpop.f32.mrf.mxu0 }
  0xfa   :  { %v293_v21 = vmax.f32 %v231_v15, 0.0 }
  0xfb   :  { %v235_v0 = vpop.f32.mrf.mxu0 }
  0xfc   :  { %v236_v19 = vadd.f32 %v1786_v13, %v235_v0  ;;  %v305_v31 = vmax.f32 %v289_v25, %v293_v21  ;;  %v1823_v25 = vld [vmem:[%s2674_s3 + $0x70] sm:$0xff] }
  0xfd   :  { %v237_v2 = vpop.f32.mrf.mxu0 }
  0xfe   :  { %v294_v29 = vmax.f32 %v236_v19, 0.0  ;;  %v1817_v19 = vld [vmem:[%s2674_s3 + $0x50] sm:$0xff] }
  0xff   :  { %v240_v3 = vpop.f32.mrf.mxu0 }
 0x100   :  { %v241_v32 = vadd.f32 %v1786_v13, %v240_v3  ;;  %v306_v42 = vmax.f32 %v290_v35, %v294_v29  ;;  %v1830_v29 = vld [vmem:[%s2674_s3 + $0x98] sm:$0xff] }
 0x101   :  { %v242_v4 = vpop.f32.mrf.mxu0  ;;  %v1836_v35 = vld [vmem:[%s2674_s3 + $0xb8] sm:$0xff] }
 0x102   :  { %v295_v44 = vmax.f32 %v241_v32, 0.0  ;;  %v1833_v32 = vld [vmem:[%s2674_s3 + $0xa8] sm:$0xff] }
 0x103   :  { %v245_v5 = vpop.f32.mrf.mxu0 }
 0x104   :  { %v246_v45 = vadd.f32 %v1786_v13, %v245_v5  ;;  %v307_v56 = vmax.f32 %v291_v48, %v295_v44  ;;  %v1845_v44 = vld [vmem:[%s2674_s3 + $0xe8] sm:$0xff] }
 0x105   :  { %v247_v6 = vpop.f32.mrf.mxu0 }
 0x106   :  { %v296_v57 = vmax.f32 %v246_v45, 0.0  ;;  %v323_v6 = vld [vmem:[%s2674_s3] sm:$0xff] }
 0x107   :  { %v250_v7 = vpop.f32.mrf.mxu0 }
 0x108   :  { %v251_v18 = vadd.f32 %v1786_v13, %v250_v7  ;;  %v308_v4 = vmax.f32 %v292_v62, %v296_v57  ;;  %v1584_v57 = vld [vmem:[%s2676_s5 + $0x40] sm:$0xff] }
 0x109   :  { %v252_v8 = vpop.f32.mrf.mxu0  ;;  %v1580_v62 = vld [vmem:[%s2676_s5 + $0x20] sm:$0xff] }
 0x10a   :  { %v297_v26 = vmax.f32 %v251_v18, 0.0  ;;  %v1809_v8 = vld [vmem:[%s2674_s3 + $0x28] sm:$0xff] }
 0x10b   :  { %v255_v9 = vpop.f32.mrf.mxu0 }
 0x10c   :  { %v256_v27 = vadd.f32 %v1786_v13, %v255_v9 }
 0x10d   :  { %v257_v10 = vpop.f32.mrf.mxu0 }
 0x10e   :  { %v298_v38 = vmax.f32 %v256_v27, 0.0  ;;  %v1808_v10 = vld [vmem:[%s2674_s3 + $0x20] sm:$0xff] }
 0x10f   :  { %v260_v11 = vpop.f32.mrf.mxu0 }
 0x110   :  { %v261_v39 = vadd.f32 %v1786_v13, %v260_v11  ;;  %v1812_v11 = vld [vmem:[%s2674_s3 + $0x38] sm:$0xff] }
 0x111   :  { %v262_v12 = vpop.f32.mrf.mxu0 }
 0x112   :  { %v299_v51 = vmax.f32 %v261_v39, 0.0 }
 0x113   :  { %v265_v14 = vpop.f32.mrf.mxu0 }
 0x114   :  { %v266_v52 = vadd.f32 %v1786_v13, %v265_v14  ;;  %v1815_v14 = vld [vmem:[%s2674_s3 + $0x48] sm:$0xff] }
 0x115   :  { %v267_v16 = vpop.f32.mrf.mxu0 }
 0x116   :  { %v300_v63 = vmax.f32 %v266_v52, 0.0  ;;  %v1814_v16 = vld [vmem:[%s2674_s3 + $0x40] sm:$0xff]  ;;  %v1589_v52 = vld [vmem:[%s2676_s5 + $0x68] sm:$0xff] }
 0x117   :  { %v270_v20 = vpop.f32.mrf.mxu0 }
 0x118   :  { %v271_v22 = vadd.f32 %v1786_v13, %v270_v20  ;;  %v1821_v20 = vld [vmem:[%s2674_s3 + $0x68] sm:$0xff] }
 0x119   :  { %v272_v24 = vpop.f32.mrf.mxu0 }
 0x11a   :  { %v301_v28 = vmax.f32 %v271_v22, 0.0  ;;  %v1820_v22 = vld [vmem:[%s2674_s3 + $0x60] sm:$0xff] }
 0x11b   :  { %v275_v30 = vpop.f32.mrf.mxu0 }
 0x11c   :  { %v309_v33 = vmax.f32 %v297_v26, %v301_v28  ;;  %v276_v34 = vadd.f32 %v1786_v13, %v275_v30  ;;  %v1827_v26 = vld [vmem:[%s2674_s3 + $0x88] sm:$0xff]  ;;  %v1826_v28 = vld [vmem:[%s2674_s3 + $0x80] sm:$0xff] }
 0x11d   :  { %v277_v37 = vpop.f32.mrf.mxu0 }
 0x11e   :  { %v313_v40 = vmax.f32 %v305_v31, %v309_v33  ;;  %v302_v41 = vmax.f32 %v276_v34, 0.0  ;;  %v1829_v31 = vld [vmem:[%s2674_s3 + $0x90] sm:$0xff]  ;;  %v1832_v34 = vld [vmem:[%s2674_s3 + $0xa0] sm:$0xff] }
 0x11f   :  { %v280_v43 = vpop.f32.mrf.mxu0  ;;  %v1835_v37 = vld [vmem:[%s2674_s3 + $0xb0] sm:$0xff] }
 0x120   :  { %318 = vst.msk [vmem:[#allocation2] sm:$0xff] %vm317_vm3, %v313_v40  ;;  %v310_v46 = vmax.f32 %v298_v38, %v302_v41  ;;  %v281_v47 = vadd.f32 %v1786_v13, %v280_v43  ;;  %v1839_v38 = vld [vmem:[%s2674_s3 + $0xc8] sm:$0xff]  ;;  %v1838_v40 = vld [vmem:[%s2674_s3 + $0xc0] sm:$0xff]  ;;  %v1842_v41 = vld [vmem:[%s2674_s3 + $0xd8] sm:$0xff] }
 0x121   :  { %v282_v50 = vpop.f32.mrf.mxu0  ;;  %v1841_v43 = vld [vmem:[%s2674_s3 + $0xd0] sm:$0xff] }
 0x122   :  { %v314_v53 = vmax.f32 %v306_v42, %v310_v46  ;;  %v303_v54 = vmax.f32 %v281_v47, 0.0  ;;  %v1844_v46 = vld [vmem:[%s2674_s3 + $0xe0] sm:$0xff]  ;;  %v1848_v47 = vld [vmem:[%s2674_s3 + $0xf8] sm:$0xff] }
 0x123   :  { %v285_v55 = vpop.f32.mrf.mxu0 }
 0x124   :  { %319 = vst.msk [vmem:[#allocation2 + $0x8] sm:$0xff] %vm317_vm3, %v314_v53  ;;  %v311_v58 = vmax.f32 %v299_v51, %v303_v54  ;;  %v286_v59 = vadd.f32 %v1786_v13, %v285_v55  ;;  %v1811_v13 = vld [vmem:[%s2674_s3 + $0x30] sm:$0xff]  ;;  %v1588_v53 = vld [vmem:[%s2676_s5 + $0x60] sm:$0xff]  ;;  %v1587_v54 = vld [vmem:[%s2676_s5 + $0x58] sm:$0xff] }
 0x125   :  { %v287_v61 = vpop.f32.mrf.mxu0  ;;  %v1590_v51 = vld [vmem:[%s2676_s5 + $0x70] sm:$0xff] }
 0x126   :  { %v315_v0 = vmax.f32 %v307_v56, %v311_v58  ;;  %v304_v2 = vmax.f32 %v286_v59, 0.0  ;;  %v1586_v55 = vld [vmem:[%s2676_s5 + $0x50] sm:$0xff]  ;;  %v1585_v56 = vld [vmem:[%s2676_s5 + $0x48] sm:$0xff]  ;;  %v1583_v58 = vld [vmem:[%s2676_s5 + $0x38] sm:$0xff] }
 0x127   :  { %v325_v3 = vld [vmem:[#allocation2 + $0x2] sm:$0x3]  ;;  %v322_v9 = vld [vmem:[#allocation2] sm:$0x3]  ;;  %v475_v12 = vld [vmem:[#allocation2 + $0x4] sm:$0x3] }
 0x128   :  { %320 = vst.msk [vmem:[#allocation2 + $0x10] sm:$0xff] %vm317_vm3, %v315_v0  ;;  %v312_v5 = vmax.f32 %v300_v63, %v304_v2  ;;  %1937 = vmatmul.mubr.msk.f32.vlgmr.msra.gmra.mxu1 %vm317_vm3, %v325_v3  ;;  %v553_v15 = vld [vmem:[#allocation2 + $0x6] sm:$0x3]  ;;  %v1582_v59 = vld [vmem:[%s2676_s5 + $0x30] sm:$0xff]  ;;  %v1581_v61 = vld [vmem:[%s2676_s5 + $0x28] sm:$0xff] }
 0x129   :  { %1940 = vmatpush3.msra.mxu1 %v324_v60  ;;  %1943 = vmatprep.mubr.msk.f32.mxu1 %vm2128_vm2, %v2127_v1  ;;  %v1579_v63 = vld [vmem:[%s2676_s5 + $0x18] sm:$0xff]  ;;  %v1578_v0 = vld [vmem:[%s2676_s5 + $0x10] sm:$0xff]  ;;  %v1577_v2 = vld [vmem:[%s2676_s5 + $0x8] sm:$0xff] }
 0x12a   :  { %v316_v7 = vmax.f32 %v308_v4, %v312_v5  ;;  %1941 = vmatprep.subr.mxu1 %v2127_v1  ;;  %v1576_v60 = vld [vmem:[%s2676_s5] sm:$0xff]  ;;  %v1683_v3 = vld [vmem:[%s2678_s7 + $0x50] sm:$0xf]  ;;  %v1682_v4 = vld [vmem:[%s2678_s7 + $0x48] sm:$0xff] }
 0x12b   :  { %1942 = vmatpush3.msra.mxu1 %v323_v6  ;;  %v631_v18 = vld [vmem:[#allocation2 + $0x8] sm:$0x3]  ;;  %v709_v21 = vld [vmem:[#allocation2 + $0xa] sm:$0x3]  ;;  %v787_v24 = vld [vmem:[#allocation2 + $0xc] sm:$0x3]  ;;  %2078 = vmatpush3.msk.msra.mxu0 %vm1695_vm4, %v1683_v3 }
 0x12c   :  { %321 = vst.msk [vmem:[#allocation2 + $0x18] sm:$0xff] %vm317_vm3, %v316_v7  ;;  %1946 = vmatprep.subr.mxu1 %v2127_v1  ;;  %1944 = vmatmul.mubr.msk.f32.vlgmr.msra.gmra.mxu1 %vm317_vm3, %v322_v9  ;;  %v865_v27 = vld [vmem:[#allocation2 + $0xe] sm:$0x3]  ;;  %v1681_v5 = vld [vmem:[%s2678_s7 + $0x40] sm:$0xff]  ;;  %v1680_v6 = vld [vmem:[%s2678_s7 + $0x38] sm:$0xff] }
 0x12d   :  { %1947 = vmatpush3.msra.mxu1 %v1809_v8  ;;  %1950 = vmatprep.mubr.msk.f32.mxu1 %vm2128_vm2, %v2127_v1  ;;  %v1679_v7 = vld [vmem:[%s2678_s7 + $0x30] sm:$0xff]  ;;  %v1678_v8 = vld [vmem:[%s2678_s7 + $0x28] sm:$0xff]  ;;  %v1677_v9 = vld [vmem:[%s2678_s7 + $0x20] sm:$0xff] }
 0x12e   :  { %1948 = vmatprep.subr.mxu1 %v2127_v1  ;;  %2079 = vmatprep.subr.mxu0 %v2127_v1 }
 0x12f   :  { %1949 = vmatpush3.msra.mxu1 %v1808_v10  ;;  %v943_v30 = vld [vmem:[#allocation2 + $0x10] sm:$0x3]  ;;  %v1021_v33 = vld [vmem:[#allocation2 + $0x12] sm:$0x3]  ;;  %v1099_v36 = vld [vmem:[#allocation2 + $0x14] sm:$0x3]  ;;  %2080 = vmatpush3.msra.mxu0 %v1682_v4 }
 0x130   :  { %1953 = vmatprep.subr.mxu1 %v2127_v1  ;;  %1951 = vmatmul.mubr.msk.f32.vlgmr.msra.gmra.mxu1 %vm317_vm3, %v475_v12  ;;  %v1177_v39 = vld [vmem:[#allocation2 + $0x16] sm:$0x3]  ;;  %v1676_v10 = vld [vmem:[%s2678_s7 + $0x18] sm:$0xff]  ;;  %v1674_v12 = vld [vmem:[%s2678_s7 + $0x8] sm:$0xff] }
 0x131   :  { %1954 = vmatpush3.msra.mxu1 %v1812_v11  ;;  %1957 = vmatprep.mubr.msk.f32.mxu1 %vm2128_vm2, %v2127_v1  ;;  %v1675_v11 = vld [vmem:[%s2678_s7 + $0x10] sm:$0xff] }
 0x132   :  { %1955 = vmatprep.subr.mxu1 %v2127_v1  ;;  %2081 = vmatprep.subr.mxu0 %v2127_v1 }
 0x133   :  { %1956 = vmatpush3.msra.mxu1 %v1811_v13  ;;  %v1255_v42 = vld [vmem:[#allocation2 + $0x18] sm:$0x3]  ;;  %v1333_v45 = vld [vmem:[#allocation2 + $0x1a] sm:$0x3]  ;;  %v1411_v48 = vld [vmem:[#allocation2 + $0x1c] sm:$0x3]  ;;  %2082 = vmatpush3.msra.mxu0 %v1681_v5 }
 0x134   :  { %1960 = vmatprep.subr.mxu1 %v2127_v1  ;;  %1958 = vmatmul.mubr.msk.f32.vlgmr.msra.gmra.mxu1 %vm317_vm3, %v553_v15  ;;  %v1489_v50 = vld [vmem:[#allocation2 + $0x1e] sm:$0x3]  ;;  %v1853_v5 = vld [vmem:[%s2679_s8] ss:$0 sm:$0xff] }
 0x135   :  { %1961 = vmatpush3.msra.mxu1 %v1815_v14  ;;  %1964 = vmatprep.mubr.msk.f32.mxu1 %vm2128_vm2, %v2127_v1 }
 0x136   :  { %1962 = vmatprep.subr.mxu1 %v2127_v1  ;;  %2083 = vmatprep.subr.mxu0 %v2127_v1 }
 0x137   :  { %1963 = vmatpush3.msra.mxu1 %v1814_v16  ;;  %2084 = vmatpush3.msra.mxu0 %v1680_v6 }
 0x138   :  { %1967 = vmatprep.subr.mxu1 %v2127_v1  ;;  %1965 = vmatmul.mubr.msk.f32.vlgmr.msra.gmra.mxu1 %vm317_vm3, %v631_v18 }
 0x139   :  { %1968 = vmatpush3.msra.mxu1 %v1818_v17  ;;  %1971 = vmatprep.mubr.msk.f32.mxu1 %vm2128_vm2, %v2127_v1 }
 0x13a   :  { %1969 = vmatprep.subr.mxu1 %v2127_v1  ;;  %2085 = vmatprep.subr.mxu0 %v2127_v1 }
 0x13b   :  { %1970 = vmatpush3.msra.mxu1 %v1817_v19  ;;  %2086 = vmatpush3.msra.mxu0 %v1679_v7 }
 0x13c   :  { %1974 = vmatprep.subr.mxu1 %v2127_v1  ;;  %1972 = vmatmul.mubr.msk.f32.vlgmr.msra.gmra.mxu1 %vm317_vm3, %v709_v21 }
 0x13d   :  { %1975 = vmatpush3.msra.mxu1 %v1821_v20  ;;  %1978 = vmatprep.mubr.msk.f32.mxu1 %vm2128_vm2, %v2127_v1 }
 0x13e   :  { %1976 = vmatprep.subr.mxu1 %v2127_v1  ;;  %2087 = vmatprep.subr.mxu0 %v2127_v1 }
 0x13f   :  { %1977 = vmatpush3.msra.mxu1 %v1820_v22  ;;  %2088 = vmatpush3.msra.mxu0 %v1678_v8 }
 0x140   :  { %1981 = vmatprep.subr.mxu1 %v2127_v1  ;;  %1979 = vmatmul.mubr.msk.f32.vlgmr.msra.gmra.mxu1 %vm317_vm3, %v787_v24 }
 0x141   :  { %1982 = vmatpush3.msra.mxu1 %v1824_v23  ;;  %1985 = vmatprep.mubr.msk.f32.mxu1 %vm2128_vm2, %v2127_v1 }
 0x142   :  { %1983 = vmatprep.subr.mxu1 %v2127_v1  ;;  %2089 = vmatprep.subr.mxu0 %v2127_v1 }
 0x143   :  { %1984 = vmatpush3.msra.mxu1 %v1823_v25  ;;  %2090 = vmatpush3.msra.mxu0 %v1677_v9 }
 0x144   :  { %1988 = vmatprep.subr.mxu1 %v2127_v1  ;;  %1986 = vmatmul.mubr.msk.f32.vlgmr.msra.gmra.mxu1 %vm317_vm3, %v865_v27 }
 0x145   :  { %1989 = vmatpush3.msra.mxu1 %v1827_v26  ;;  %1992 = vmatprep.mubr.msk.f32.mxu1 %vm2128_vm2, %v2127_v1 }
 0x146   :  { %1990 = vmatprep.subr.mxu1 %v2127_v1  ;;  %2091 = vmatprep.subr.mxu0 %v2127_v1 }
 0x147   :  { %1991 = vmatpush3.msra.mxu1 %v1826_v28  ;;  %2092 = vmatpush3.msra.mxu0 %v1676_v10 }
 0x148   :  { %1995 = vmatprep.subr.mxu1 %v2127_v1  ;;  %1993 = vmatmul.mubr.msk.f32.vlgmr.msra.gmra.mxu1 %vm317_vm3, %v943_v30 }
 0x149   :  { %1996 = vmatpush3.msra.mxu1 %v1830_v29  ;;  %1999 = vmatprep.mubr.msk.f32.mxu1 %vm2128_vm2, %v2127_v1 }
 0x14a   :  { %1997 = vmatprep.subr.mxu1 %v2127_v1  ;;  %2093 = vmatprep.subr.mxu0 %v2127_v1 }
 0x14b   :  { %1998 = vmatpush3.msra.mxu1 %v1829_v31  ;;  %2094 = vmatpush3.msra.mxu0 %v1675_v11 }
 0x14c   :  { %2002 = vmatprep.subr.mxu1 %v2127_v1  ;;  %2000 = vmatmul.mubr.msk.f32.vlgmr.msra.gmra.mxu1 %vm317_vm3, %v1021_v33 }
 0x14d   :  { %2003 = vmatpush3.msra.mxu1 %v1833_v32  ;;  %2006 = vmatprep.mubr.msk.f32.mxu1 %vm2128_vm2, %v2127_v1 }
 0x14e   :  { %2004 = vmatprep.subr.mxu1 %v2127_v1  ;;  %2095 = vmatprep.subr.mxu0 %v2127_v1 }
 0x14f   :  { %2005 = vmatpush3.msra.mxu1 %v1832_v34  ;;  %2096 = vmatpush3.msra.mxu0 %v1674_v12 }
 0x150   :  { %2009 = vmatprep.subr.mxu1 %v2127_v1  ;;  %2007 = vmatmul.mubr.msk.f32.vlgmr.msra.gmra.mxu1 %vm317_vm3, %v1099_v36 }
 0x151   :  { %2010 = vmatpush3.msra.mxu1 %v1836_v35  ;;  %2013 = vmatprep.mubr.msk.f32.mxu1 %vm2128_vm2, %v2127_v1 }
 0x152   :  { %2011 = vmatprep.subr.mxu1 %v2127_v1  ;;  %2097 = vmatprep.subr.mxu0 %v2127_v1 }
 0x153   :  { %2012 = vmatpush3.msra.mxu1 %v1835_v37 }
 0x154   :  { %2016 = vmatprep.subr.mxu1 %v2127_v1  ;;  %2014 = vmatmul.mubr.msk.f32.vlgmr.msra.gmra.mxu1 %vm317_vm3, %v1177_v39 }
 0x155   :  { %2017 = vmatpush3.msra.mxu1 %v1839_v38  ;;  %2020 = vmatprep.mubr.msk.f32.mxu1 %vm2128_vm2, %v2127_v1 }
 0x156   :  { %2018 = vmatprep.subr.mxu1 %v2127_v1 }
 0x157   :  { %2019 = vmatpush3.msra.mxu1 %v1838_v40 }
 0x158   :  { %2023 = vmatprep.subr.mxu1 %v2127_v1  ;;  %2021 = vmatmul.mubr.msk.f32.vlgmr.msra.gmra.mxu1 %vm317_vm3, %v1255_v42 }
 0x159   :  { %2024 = vmatpush3.msra.mxu1 %v1842_v41  ;;  %2027 = vmatprep.mubr.msk.f32.mxu1 %vm2128_vm2, %v2127_v1 }
 0x15a   :  { %2025 = vmatprep.subr.mxu1 %v2127_v1 }
 0x15b   :  { %2026 = vmatpush3.msra.mxu1 %v1841_v43 }
 0x15c   :  { %2030 = vmatprep.subr.mxu1 %v2127_v1  ;;  %2028 = vmatmul.mubr.msk.f32.vlgmr.msra.gmra.mxu1 %vm317_vm3, %v1333_v45 }
 0x15d   :  { %2031 = vmatpush3.msra.mxu1 %v1845_v44  ;;  %2034 = vmatprep.mubr.msk.f32.mxu1 %vm2128_vm2, %v2127_v1 }
 0x15e   :  { %2032 = vmatprep.subr.mxu1 %v2127_v1 }
 0x15f   :  { %2033 = vmatpush3.msra.mxu1 %v1844_v46 }
 0x160   :  { %2037 = vmatprep.subr.mxu1 %v2127_v1  ;;  %2035 = vmatmul.mubr.msk.f32.vlgmr.msra.gmra.mxu1 %vm317_vm3, %v1411_v48 }
 0x161   :  { %2038 = vmatpush3.msra.mxu1 %v1848_v47  ;;  %2041 = vmatprep.mubr.msk.f32.mxu1 %vm2128_vm2, %v2127_v1 }
 0x162   :  { %2039 = vmatprep.subr.mxu1 %v2127_v1 }
 0x163   :  { %2040 = vmatpush3.msra.mxu1 %v1847_v49 }
 0x164   :  { %2042 = vmatmul.mubr.msk.f32.vlgmr.msra.gmra.mxu1 %vm317_vm3, %v1489_v50  ;;  %2044 = vmatprep.subr.mxu1 %v2127_v1 }
 0x165   :  { %2074 = vmatprep.mubr.msk.f32.mxu1 %vm2128_vm2, %v2127_v1  ;;  %2045 = vmatpush3.msra.mxu1 %v1590_v51 }
 0x166   :  { %2046 = vmatprep.subr.mxu1 %v2127_v1 }
 0x167   :  { %2047 = vmatpush3.msra.mxu1 %v1589_v52 }
 0x168   :  { %2048 = vmatprep.subr.mxu1 %v2127_v1 }
 0x169   :  { %2049 = vmatpush3.msra.mxu1 %v1588_v53 }
 0x16a   :  { %2050 = vmatprep.subr.mxu1 %v2127_v1 }
 0x16b   :  { %2051 = vmatpush3.msra.mxu1 %v1587_v54 }
 0x16c   :  { %2052 = vmatprep.subr.mxu1 %v2127_v1 }
 0x16d   :  { %2053 = vmatpush3.msra.mxu1 %v1586_v55 }
 0x16e   :  { %2054 = vmatprep.subr.mxu1 %v2127_v1 }
 0x16f   :  { %2055 = vmatpush3.msra.mxu1 %v1585_v56 }
 0x170   :  { %2056 = vmatprep.subr.mxu1 %v2127_v1 }
 0x171   :  { %2057 = vmatpush3.msra.mxu1 %v1584_v57  ;;  %v1850_v57 = vld [vmem:[%s2675_s4] ss:$0 sm:$0xff] }
 0x172   :  { %2058 = vmatprep.subr.mxu1 %v2127_v1 }
 0x173   :  { %2059 = vmatpush3.msra.mxu1 %v1583_v58 }
 0x174   :  { %2060 = vmatprep.subr.mxu1 %v2127_v1 }
 0x175   :  { %2061 = vmatpush3.msra.mxu1 %v1582_v59 }
 0x176   :  { %2062 = vmatprep.subr.mxu1 %v2127_v1 }
 0x177   :  { %2063 = vmatpush3.msra.mxu1 %v1581_v61 }
 0x178   :  { %2064 = vmatprep.subr.mxu1 %v2127_v1 }
 0x179   :  { %2065 = vmatpush3.msra.mxu1 %v1580_v62 }
 0x17a   :  { %2066 = vmatprep.subr.mxu1 %v2127_v1 }
 0x17b   :  { %2067 = vmatpush3.msra.mxu1 %v1579_v63  ;;  %v1673_v63 = vld [vmem:[%s2678_s7] sm:$0xff] }
 0x17c   :  { %2068 = vmatprep.subr.mxu1 %v2127_v1  ;;  %2098 = vmatpush3.msra.mxu0 %v1673_v63 }
 0x17d   :  { %2069 = vmatpush3.msra.mxu1 %v1578_v0  ;;  %v1851_v0 = vld [vmem:[%s2677_s6] ss:$0 sm:$0xff]  ;;  %s2105_s6 = scalar_lea.vmem %s1779_s24, 32 }
 0x17e   :  { %2070 = vmatprep.subr.mxu1 %v2127_v1  ;;  %p2106_p0 = scmp.ne.s32.totalorder %s1779_s24, %s2105_s6  ;;  %p2111_p2 = scmp.lt.s32.totalorder %s2105_s6, %s2105_s6 }
 0x17f   :  { %2071 = vmatpush3.msra.mxu1 %v1577_v2 }
 0x180   :  { %2072 = vmatprep.subr.mxu1 %v2127_v1  ;;  %p2112_p3 = por %p2111_p2, %p2110_p1 }
 0x181   :  { %2073 = vmatpush3.msra.mxu1 %v1576_v60 }
 0x182   :  { %p2113_p4 = pnand %p2112_p3, %p2106_p0 }
 0x1e8   :  { %v398_v13 = vpop.f32.mrf.mxu1 }
 0x1ea   :  { %v1938_v14 = vpop.f32.mrf.mxu1 }
 0x1ec   :  { %v471_v15 = vpop.f32.mrf.mxu1 }
 0x1ed   :  { %v472_v30 = vadd.f32 %v471_v15, %v398_v13 }
 0x1ee   :  { %v1945_v16 = vpop.f32.mrf.mxu1 }
 0x1f0   :  { %v548_v17 = vpop.f32.mrf.mxu1 }
 0x1f1   :  { %v552_v1 = vadd.f32 %v548_v17, %v472_v30 }
 0x1f2   :  { %v1952_v18 = vpop.f32.mrf.mxu1 }
 0x1f4   :  { %v626_v19 = vpop.f32.mrf.mxu1 }
 0x1f5   :  { %v630_v33 = vadd.f32 %v626_v19, %v552_v1 }
 0x1f6   :  { %v1959_v20 = vpop.f32.mrf.mxu1 }
 0x1f8   :  { %v704_v21 = vpop.f32.mrf.mxu1 }
 0x1f9   :  { %v708_v35 = vadd.f32 %v704_v21, %v630_v33 }
 0x1fa   :  { %v1966_v22 = vpop.f32.mrf.mxu1 }
 0x1fc   :  { %v782_v23 = vpop.f32.mrf.mxu1 }
 0x1fd   :  { %v786_v37 = vadd.f32 %v782_v23, %v708_v35 }
 0x1fe   :  { %v1973_v24 = vpop.f32.mrf.mxu1 }
 0x200   :  { %v860_v25 = vpop.f32.mrf.mxu1 }
 0x201   :  { %v864_v39 = vadd.f32 %v860_v25, %v786_v37 }
 0x202   :  { %v1980_v26 = vpop.f32.mrf.mxu1 }
 0x204   :  { %v938_v27 = vpop.f32.mrf.mxu1 }
 0x205   :  { %v942_v41 = vadd.f32 %v938_v27, %v864_v39 }
 0x206   :  { %v1987_v28 = vpop.f32.mrf.mxu1 }
 0x208   :  { %v1016_v29 = vpop.f32.mrf.mxu1 }
 0x209   :  { %v1020_v43 = vadd.f32 %v1016_v29, %v942_v41 }
 0x20a   :  { %v1994_v31 = vpop.f32.mrf.mxu1 }
 0x20c   :  { %v1094_v32 = vpop.f32.mrf.mxu1 }
 0x20d   :  { %v1098_v45 = vadd.f32 %v1094_v32, %v1020_v43 }
 0x20e   :  { %v2001_v34 = vpop.f32.mrf.mxu1 }
 0x210   :  { %v1172_v36 = vpop.f32.mrf.mxu1 }
 0x211   :  { %v1176_v47 = vadd.f32 %v1172_v36, %v1098_v45 }
 0x212   :  { %v2008_v38 = vpop.f32.mrf.mxu1 }
 0x214   :  { %v1250_v40 = vpop.f32.mrf.mxu1 }
 0x215   :  { %v1254_v49 = vadd.f32 %v1250_v40, %v1176_v47 }
 0x216   :  { %v2015_v42 = vpop.f32.mrf.mxu1 }
 0x218   :  { %v1328_v44 = vpop.f32.mrf.mxu1 }
 0x219   :  { %v1332_v51 = vadd.f32 %v1328_v44, %v1254_v49 }
 0x21a   :  { %v2022_v46 = vpop.f32.mrf.mxu1 }
 0x21c   :  { %v1406_v48 = vpop.f32.mrf.mxu1 }
 0x21d   :  { %v1410_v53 = vadd.f32 %v1406_v48, %v1332_v51 }
 0x21e   :  { %v2029_v50 = vpop.f32.mrf.mxu1 }
 0x220   :  { %v1484_v52 = vpop.f32.mrf.mxu1 }
 0x221   :  { %v1488_v55 = vadd.f32 %v1484_v52, %v1410_v53 }
 0x222   :  { %v2036_v54 = vpop.f32.mrf.mxu1 }
 0x224   :  { %v1562_v56 = vpop.f32.mrf.mxu1 }
 0x225   :  { %v1566_v58 = vadd.f32 %v1562_v56, %v1488_v55 }
 0x226   :  { %v2043_v59 = vpop.f32.mrf.mxu1 }
 0x227   :  { %v1574_v61 = vadd.f32 %v1850_v57, %v1566_v58 }
 0x229   :  { %v1575_v62 = vmax.f32 %v1574_v61, 0.0 }
 0x22b   :  { %2075 = vmatmul.mubr.msk.f32.vlgmr.msra.gmra.mxu1 %vm1598_vm5, %v1575_v62 }
 0x2eb   :  { %v1668_v2 = vpop.f32.mrf.mxu1 }
 0x2ec   :  { %v1669_v60 = vadd.f32 %v1851_v0, %v1668_v2 }
 0x2ed   :  { %v2076_v3 = vpop.f32.mrf.mxu1 }
 0x2ee   :  { %v1672_v4 = vmax.f32 %v1669_v60, 0.0 }
 0x2f0   :  { %2100 = vmatmul.mubr.msk.f32.vlgmr.msra.gmra.mxu0 %vm1691_vm6, %v1672_v4 }
 0x3b0   :  { %v1765_v6 = vpop.f32.mrf.mxu0 }
 0x3b1   :  { %v1766_v7 = vadd.f32 %v1853_v5, %v1765_v6 }
 0x3b2   :  { %v2101_v8 = vpop.f32.mrf.mxu0 }
 0x3b3   :  { %v1769_v9 = vmax.f32 %v1766_v7, 0.0 }
 0x3b5   :  { %1771 = vst.msk [vmem:[#allocation3] sm:$0x3] %vm1770_vm7, %v1769_v9 }
 0x3b6   :  { %2116 = shalt.err (!%p2113_p4)
}
 0x3b7   :  { %1781 = dma.vmem_to_hbm [thread:$0]  %s1779_s24, 32, %s2680_s9, [#allocation4]  }
 0x3b8   :  { %2125 = dma.done.wait [#allocation4], 32  }
 0x3b9   :  { %2126 = vsyncadd [#allocation4], 4294967264 }
 0x3ba   :  { %1785 = vsyncpa [#allocation4], 1 }

</bundles_post_ra>
